<compile_context>
chip_gen: v6e
topology: v6e:2x2x1
jax: 0.10.0
libtpu: 0.0.40
codegen_flags: <defaults>
</compile_context>

<pallas_src>
import jax
import jax.numpy as jnp
from jax.experimental import pallas as pl
from jax.experimental.pallas import tpu as pltpu

IN_DIM = 784
HID_DIM = 400
LATENT_DIM = 32

HID_PAD = 512          # hidden padded to 4*128 (lives only in packed weights)
HEAD_DIM = 2 * LATENT_DIM  # fused mu|log_var head output width (64)


def _round_up(x, m):
    return (x + m - 1) // m * m


def _pick_tb(b):
    """Batch tile: multiple of 16 rows (bf16 sublane packing); >= 2 tiles once the
    batch is big enough so v7x's two TensorCores both get work."""
    if b <= 128:
        return _round_up(max(b, 1), 16)
    if b <= 512:
        return _round_up(-(-b // 2), 16)          # exactly two tiles
    n = -(-b // 256)
    if n % 2:                                      # keep tile count even when cheap
        n += 1
    return _round_up(-(-b // n), 16)


def _vae_kernel(x_ref, eps_ref,
                w1_ref, b1_ref,
                w2_ref, b2_ref,
                w3_ref, b3_ref,
                w4_ref, b4_ref,
                recon_ref, ml_ref):
    x = x_ref[...]          # [TB, 784]  bf16
    eps = eps_ref[...]      # [TB, 32]   f32

    # ---- encode: fc1 + ReLU (bf16 x bf16 -> f32 accumulate) -----------------
    h1 = jnp.dot(x, w1_ref[...], preferred_element_type=jnp.float32) + b1_ref[...]
    h1 = jnp.maximum(h1, 0.0)                                    # [TB, 512] f32

    # ---- fused mu|log_var head (fc2m | fc2s packed into one matmul) ---------
    ml = jnp.dot(h1.astype(jnp.bfloat16), w2_ref[...],
                 preferred_element_type=jnp.float32) + b2_ref[...]   # [TB, 64] f32
    mu = ml[:, :LATENT_DIM]
    log_var = ml[:, LATENT_DIM:]

    # ---- reparameterize (training): z = eps * exp(0.5*log_var) + mu (f32) ---
    z = eps * jnp.exp(log_var * 0.5) + mu                        # [TB, 32] f32

    # ---- decode: fc3 + ReLU, fc4 + sigmoid -----------------------------------
    h3 = jnp.dot(z.astype(jnp.bfloat16), w3_ref[...],
                 preferred_element_type=jnp.float32) + b3_ref[...]
    h3 = jnp.maximum(h3, 0.0)                                    # [TB, 512] f32
    logits = jnp.dot(h3.astype(jnp.bfloat16), w4_ref[...],
                     preferred_element_type=jnp.float32) + b4_ref[...]

    recon_ref[...] = jax.nn.sigmoid(logits).astype(jnp.bfloat16)  # [TB, 784] bf16
    ml_ref[...] = ml                                              # [TB, 64]  f32


def pack_params(p):
    """Pad the hidden dim to 512, fuse the two encoder heads, cast weights to bf16.
    Biases stay f32. Weights stored as [in, out]."""
    w1 = jnp.zeros((IN_DIM, HID_PAD), jnp.float32).at[:, :HID_DIM].set(p["w1"])
    b1 = jnp.zeros((1, HID_PAD), jnp.float32).at[:, :HID_DIM].set(p["b1"])

    w2 = jnp.zeros((HID_PAD, HEAD_DIM), jnp.float32)
    w2 = w2.at[:HID_DIM, :LATENT_DIM].set(p["w2m"])
    w2 = w2.at[:HID_DIM, LATENT_DIM:].set(p["w2s"])
    b2 = jnp.concatenate([p["b2m"], p["b2s"]], axis=-1)           # [1, 64]

    w3 = jnp.zeros((LATENT_DIM, HID_PAD), jnp.float32).at[:, :HID_DIM].set(p["w3"])
    b3 = jnp.zeros((1, HID_PAD), jnp.float32).at[:, :HID_DIM].set(p["b3"])

    w4 = jnp.zeros((HID_PAD, IN_DIM), jnp.float32).at[:HID_DIM, :].set(p["w4"])
    b4 = p["b4"]                                                  # [1, 784]

    return {
        "w1": w1.astype(jnp.bfloat16), "b1": b1,
        "w2": w2.astype(jnp.bfloat16), "b2": b2.astype(jnp.float32),
        "w3": w3.astype(jnp.bfloat16), "b3": b3,
        "w4": w4.astype(jnp.bfloat16), "b4": b4.astype(jnp.float32),
    }


def vae_forward(x_img, eps, packed):
    """x_img: [B, ...] f32 (flattened to [-1, 784] like input.view(-1, 784));
    eps: [B, 32] f32 standard-normal; packed: pack_params() output.
    Returns (recon [B,784] f32, mu [B,32] f32, log_var [B,32] f32)."""
    x = x_img.reshape(-1, IN_DIM)
    B = x.shape[0]

    TB = _pick_tb(B)
    B_pad = _round_up(B, TB)
    n_tiles = B_pad // TB

    x_b = x.astype(jnp.bfloat16)
    eps_f = eps.astype(jnp.float32)
    if B_pad != B:
        x_b = jnp.pad(x_b, ((0, B_pad - B), (0, 0)))
        eps_f = jnp.pad(eps_f, ((0, B_pad - B), (0, 0)))

    # Advisory cost estimate so XLA schedules the surrounding ops sensibly.
    flops = 2 * B_pad * (IN_DIM * HID_PAD + HID_PAD * HEAD_DIM
                         + LATENT_DIM * HID_PAD + HID_PAD * IN_DIM)
    transcendentals = B_pad * (LATENT_DIM + IN_DIM)
    weight_bytes = 2 * (IN_DIM * HID_PAD + HID_PAD * HEAD_DIM
                        + LATENT_DIM * HID_PAD + HID_PAD * IN_DIM)
    bias_bytes = 4 * (HID_PAD + HEAD_DIM + HID_PAD + IN_DIM)
    act_bytes = B_pad * (2 * IN_DIM + 4 * LATENT_DIM      # x bf16 in, eps f32 in
                         + 2 * IN_DIM + 4 * HEAD_DIM)     # recon bf16 out, ml f32 out
    cost = pl.CostEstimate(flops=flops, transcendentals=transcendentals,
                           bytes_accessed=weight_bytes + bias_bytes + act_bytes)

    batch_map = lambda i: (i, 0)    # activations tiled over batch
    const_map = lambda i: (0, 0)    # weights/biases VMEM-resident across all tiles

    def const_spec(shape):
        # Constant blocks: single-buffered (index never changes -> no re-fetch needed).
        return pl.BlockSpec(shape, const_map, pipeline_mode=pl.Buffered(1))

    recon_p, ml = pl.pallas_call(
        _vae_kernel,
        out_shape=(
            jax.ShapeDtypeStruct((B_pad, IN_DIM), jnp.bfloat16),
            jax.ShapeDtypeStruct((B_pad, HEAD_DIM), jnp.float32),
        ),
        grid_spec=pltpu.PrefetchScalarGridSpec(
            num_scalar_prefetch=0,
            grid=(n_tiles,),
            in_specs=[
                pl.BlockSpec((TB, IN_DIM), batch_map),        # x (bf16)
                pl.BlockSpec((TB, LATENT_DIM), batch_map),    # eps (f32)
                const_spec((IN_DIM, HID_PAD)),                # w1 (bf16)
                const_spec((1, HID_PAD)),                     # b1
                const_spec((HID_PAD, HEAD_DIM)),              # w2 fused mu|logvar (bf16)
                const_spec((1, HEAD_DIM)),                    # b2
                const_spec((LATENT_DIM, HID_PAD)),            # w3 (bf16)
                const_spec((1, HID_PAD)),                     # b3
                const_spec((HID_PAD, IN_DIM)),                # w4 (bf16)
                const_spec((1, IN_DIM)),                      # b4
            ],
            out_specs=[
                pl.BlockSpec((TB, IN_DIM), batch_map),        # recon (bf16)
                pl.BlockSpec((TB, HEAD_DIM), batch_map),      # mu|log_var (f32)
            ],
        ),
        compiler_params=pltpu.CompilerParams(
            dimension_semantics=("parallel",),
            vmem_limit_bytes=32 * 1024 * 1024,
        ),
        cost_estimate=cost,
    )(
        x_b, eps_f,
        packed["w1"], packed["b1"],
        packed["w2"], packed["b2"],
        packed["w3"], packed["b3"],
        packed["w4"], packed["b4"],
    )

    recon = recon_p[:B].astype(jnp.float32)
    mu = ml[:B, :LATENT_DIM]
    log_var = ml[:B, LATENT_DIM:]
    return recon, mu, log_var


def init_params(key):
    """Deterministic PyTorch-like init. Weights stored as [in, out]; biases as [1, out]."""
    def linear(k, fan_in, fan_out):
        kw, kb = jax.random.split(k)
        bound = 1.0 / jnp.sqrt(fan_in)
        w = jax.random.uniform(kw, (fan_in, fan_out), jnp.float32, -bound, bound)
        b = jax.random.uniform(kb, (1, fan_out), jnp.float32, -bound, bound)
        return w, b

    k1, k2, k3, k4, k5 = jax.random.split(key, 5)
    w1, b1 = linear(k1, IN_DIM, HID_DIM)
    w2m, b2m = linear(k2, HID_DIM, LATENT_DIM)
    w2s, b2s = linear(k3, HID_DIM, LATENT_DIM)
    w3, b3 = linear(k4, LATENT_DIM, HID_DIM)
    w4, b4 = linear(k5, HID_DIM, IN_DIM)
    return {
        "w1": w1, "b1": b1,
        "w2m": w2m, "b2m": b2m,
        "w2s": w2s, "b2s": b2s,
        "w3": w3, "b3": b3,
        "w4": w4, "b4": b4,
    }


if __name__ == "__main__":
    key = jax.random.PRNGKey(0)
    k_params, k_x, k_eps = jax.random.split(key, 3)

    B = 8
    raw = init_params(k_params)
    packed = pack_params(raw)
    x_img = jax.random.uniform(k_x, (B, 1, 28, 28), jnp.float32)   # MNIST-like input
    eps = jax.random.normal(k_eps, (B, LATENT_DIM), jnp.float32)   # reparameterization noise

    recon, mu, log_var = jax.block_until_ready(
        jax.jit(vae_forward)(x_img, eps, packed))

    # Plain-JAX reference that mirrors the kernel arithmetic:
    # bf16 operands for every matmul, f32 accumulation, f32 bias/exp/relu/sigmoid,
    # recon rounded to bf16 (kernel stores recon as bf16).
    def dot_bf16(a, w):
        return jnp.dot(a.astype(jnp.bfloat16), w.astype(jnp.bfloat16),
                       preferred_element_type=jnp.float32)

    x = x_img.reshape(-1, IN_DIM)
    h1 = jnp.maximum(dot_bf16(x, raw["w1"]) + raw["b1"], 0.0)
    mu_ref = dot_bf16(h1, raw["w2m"]) + raw["b2m"]
    lv_ref = dot_bf16(h1, raw["w2s"]) + raw["b2s"]
    z_ref = eps * jnp.exp(0.5 * lv_ref) + mu_ref
    h3 = jnp.maximum(dot_bf16(z_ref, raw["w3"]) + raw["b3"], 0.0)
    rec_ref = jax.nn.sigmoid(dot_bf16(h3, raw["w4"]) + raw["b4"])
    rec_ref = rec_ref.astype(jnp.bfloat16).astype(jnp.float32)

    assert recon.shape == (B, IN_DIM) and mu.shape == (B, LATENT_DIM) \
        and log_var.shape == (B, LATENT_DIM)
    assert jnp.allclose(mu, mu_ref, atol=2e-3, rtol=2e-3)
    assert jnp.allclose(log_var, lv_ref, atol=2e-3, rtol=2e-3)
    assert jnp.allclose(recon, rec_ref, atol=1e-2, rtol=1e-2)

    print("KERNEL_OK")
</pallas_src>

<mosaic_0001>
module attributes {stable_mosaic.version = 11 : i64} {
  func.func @_vae_kernel(%arg0: i32, %arg1: memref<16x784xbf16, #tpu.memory_space<vmem>>, %arg2: memref<16x32xf32, #tpu.memory_space<vmem>>, %arg3: memref<784x512xbf16, #tpu.memory_space<vmem>>, %arg4: memref<1x512xf32, #tpu.memory_space<vmem>>, %arg5: memref<512x64xbf16, #tpu.memory_space<vmem>>, %arg6: memref<1x64xf32, #tpu.memory_space<vmem>>, %arg7: memref<32x512xbf16, #tpu.memory_space<vmem>>, %arg8: memref<1x512xf32, #tpu.memory_space<vmem>>, %arg9: memref<512x784xbf16, #tpu.memory_space<vmem>>, %arg10: memref<1x784xf32, #tpu.memory_space<vmem>>, %arg11: memref<16x784xbf16, #tpu.memory_space<vmem>>, %arg12: memref<16x64xf32, #tpu.memory_space<vmem>>) attributes {dimension_semantics = [#tpu.dimension_semantics<parallel>], iteration_bounds = array<i64: 1>, scalar_prefetch = 0 : i64, scratch_operands = 0 : i64, tpu.core_type = #tpu.core_type<tc>, window_params = [{transform_indices = @transform_0, window_bounds = array<i64: 16, 784>}, {transform_indices = @transform_1, window_bounds = array<i64: 16, 32>}, {pipeline_mode = #tpu.pipeline_mode<synchronous>, transform_indices = @transform_2, window_bounds = array<i64: 784, 512>}, {pipeline_mode = #tpu.pipeline_mode<synchronous>, transform_indices = @transform_3, window_bounds = array<i64: 1, 512>}, {pipeline_mode = #tpu.pipeline_mode<synchronous>, transform_indices = @transform_4, window_bounds = array<i64: 512, 64>}, {pipeline_mode = #tpu.pipeline_mode<synchronous>, transform_indices = @transform_5, window_bounds = array<i64: 1, 64>}, {pipeline_mode = #tpu.pipeline_mode<synchronous>, transform_indices = @transform_6, window_bounds = array<i64: 32, 512>}, {pipeline_mode = #tpu.pipeline_mode<synchronous>, transform_indices = @transform_7, window_bounds = array<i64: 1, 512>}, {pipeline_mode = #tpu.pipeline_mode<synchronous>, transform_indices = @transform_8, window_bounds = array<i64: 512, 784>}, {pipeline_mode = #tpu.pipeline_mode<synchronous>, transform_indices = @transform_9, window_bounds = array<i64: 1, 784>}, {transform_indices = @transform_10, window_bounds = array<i64: 16, 784>}, {transform_indices = @transform_11, window_bounds = array<i64: 16, 64>}]} {
    %c0 = arith.constant 0 : index
    %c0_0 = arith.constant 0 : index
    %0 = vector.load %arg1[%c0, %c0_0] : memref<16x784xbf16, #tpu.memory_space<vmem>>, vector<16x784xbf16>
    %c0_1 = arith.constant 0 : index
    %c0_2 = arith.constant 0 : index
    %1 = vector.load %arg2[%c0_1, %c0_2] : memref<16x32xf32, #tpu.memory_space<vmem>>, vector<16x32xf32>
    %c0_3 = arith.constant 0 : index
    %c0_4 = arith.constant 0 : index
    %2 = vector.load %arg3[%c0_3, %c0_4] : memref<784x512xbf16, #tpu.memory_space<vmem>>, vector<784x512xbf16>
    %cst = arith.constant dense<0.000000e+00> : vector<16x512xf32>
    %3 = tpu.matmul %0, %2, %cst {dimension_numbers = #tpu.dot_dimension_numbers<[1], [0], [0], [1], [0, 0, 1, 1], [], []>} : vector<16x784xbf16>, vector<784x512xbf16>, vector<16x512xf32> -> vector<16x512xf32>
    %c0_5 = arith.constant 0 : index
    %c0_6 = arith.constant 0 : index
    %4 = vector.load %arg4[%c0_5, %c0_6] : memref<1x512xf32, #tpu.memory_space<vmem>>, vector<1x512xf32>
    %5 = vector.broadcast %4 : vector<1x512xf32> to vector<16x512xf32>
    %6 = arith.addf %3, %5 : vector<16x512xf32>
    %cst_7 = arith.constant 0.000000e+00 : f32
    %7 = vector.broadcast %cst_7 : f32 to vector<16x512xf32>
    %8 = arith.maximumf %6, %7 : vector<16x512xf32>
    %9 = arith.truncf %8 : vector<16x512xf32> to vector<16x512xbf16>
    %c0_8 = arith.constant 0 : index
    %c0_9 = arith.constant 0 : index
    %10 = vector.load %arg5[%c0_8, %c0_9] : memref<512x64xbf16, #tpu.memory_space<vmem>>, vector<512x64xbf16>
    %cst_10 = arith.constant dense<0.000000e+00> : vector<16x64xf32>
    %11 = tpu.matmul %9, %10, %cst_10 {dimension_numbers = #tpu.dot_dimension_numbers<[1], [0], [0], [1], [0, 0, 1, 1], [], []>} : vector<16x512xbf16>, vector<512x64xbf16>, vector<16x64xf32> -> vector<16x64xf32>
    %c0_11 = arith.constant 0 : index
    %c0_12 = arith.constant 0 : index
    %12 = vector.load %arg6[%c0_11, %c0_12] : memref<1x64xf32, #tpu.memory_space<vmem>>, vector<1x64xf32>
    %13 = vector.broadcast %12 : vector<1x64xf32> to vector<16x64xf32>
    %14 = arith.addf %11, %13 : vector<16x64xf32>
    %15 = vector.extract_strided_slice %14 {offsets = [0, 0], sizes = [16, 32], strides = [1, 1]} : vector<16x64xf32> to vector<16x32xf32>
    %16 = vector.extract_strided_slice %14 {offsets = [0, 32], sizes = [16, 32], strides = [1, 1]} : vector<16x64xf32> to vector<16x32xf32>
    %cst_13 = arith.constant 5.000000e-01 : f32
    %17 = vector.broadcast %cst_13 : f32 to vector<16x32xf32>
    %18 = arith.mulf %16, %17 : vector<16x32xf32>
    %19 = math.exp %18 : vector<16x32xf32>
    %20 = arith.mulf %1, %19 : vector<16x32xf32>
    %21 = arith.addf %20, %15 : vector<16x32xf32>
    %22 = arith.truncf %21 : vector<16x32xf32> to vector<16x32xbf16>
    %c0_14 = arith.constant 0 : index
    %c0_15 = arith.constant 0 : index
    %23 = vector.load %arg7[%c0_14, %c0_15] : memref<32x512xbf16, #tpu.memory_space<vmem>>, vector<32x512xbf16>
    %cst_16 = arith.constant dense<0.000000e+00> : vector<16x512xf32>
    %24 = tpu.matmul %22, %23, %cst_16 {dimension_numbers = #tpu.dot_dimension_numbers<[1], [0], [0], [1], [0, 0, 1, 1], [], []>} : vector<16x32xbf16>, vector<32x512xbf16>, vector<16x512xf32> -> vector<16x512xf32>
    %c0_17 = arith.constant 0 : index
    %c0_18 = arith.constant 0 : index
    %25 = vector.load %arg8[%c0_17, %c0_18] : memref<1x512xf32, #tpu.memory_space<vmem>>, vector<1x512xf32>
    %26 = vector.broadcast %25 : vector<1x512xf32> to vector<16x512xf32>
    %27 = arith.addf %24, %26 : vector<16x512xf32>
    %cst_19 = arith.constant 0.000000e+00 : f32
    %28 = vector.broadcast %cst_19 : f32 to vector<16x512xf32>
    %29 = arith.maximumf %27, %28 : vector<16x512xf32>
    %30 = arith.truncf %29 : vector<16x512xf32> to vector<16x512xbf16>
    %c0_20 = arith.constant 0 : index
    %c0_21 = arith.constant 0 : index
    %31 = vector.load %arg9[%c0_20, %c0_21] : memref<512x784xbf16, #tpu.memory_space<vmem>>, vector<512x784xbf16>
    %cst_22 = arith.constant dense<0.000000e+00> : vector<16x784xf32>
    %32 = tpu.matmul %30, %31, %cst_22 {dimension_numbers = #tpu.dot_dimension_numbers<[1], [0], [0], [1], [0, 0, 1, 1], [], []>} : vector<16x512xbf16>, vector<512x784xbf16>, vector<16x784xf32> -> vector<16x784xf32>
    %c0_23 = arith.constant 0 : index
    %c0_24 = arith.constant 0 : index
    %33 = vector.load %arg10[%c0_23, %c0_24] : memref<1x784xf32, #tpu.memory_space<vmem>>, vector<1x784xf32>
    %34 = vector.broadcast %33 : vector<1x784xf32> to vector<16x784xf32>
    %35 = arith.addf %32, %34 : vector<16x784xf32>
    %36 = arith.negf %35 : vector<16x784xf32>
    %37 = math.exp %36 : vector<16x784xf32>
    %cst_25 = arith.constant 1.000000e+00 : f32
    %38 = vector.broadcast %cst_25 : f32 to vector<16x784xf32>
    %39 = arith.addf %38, %37 : vector<16x784xf32>
    %40 = arith.divf %38, %39 : vector<16x784xf32>
    %41 = arith.truncf %40 : vector<16x784xf32> to vector<16x784xbf16>
    %c0_26 = arith.constant 0 : index
    %c0_27 = arith.constant 0 : index
    %42 = vector.load %arg11[%c0_26, %c0_27] : memref<16x784xbf16, #tpu.memory_space<vmem>>, vector<16x784xbf16>
    tpu.vector_store %arg11[%c0_26, %c0_27], %41 {strides = array<i32>} : memref<16x784xbf16, #tpu.memory_space<vmem>>, vector<16x784xbf16>,
    %c0_28 = arith.constant 0 : index
    %c0_29 = arith.constant 0 : index
    %43 = vector.load %arg12[%c0_28, %c0_29] : memref<16x64xf32, #tpu.memory_space<vmem>>, vector<16x64xf32>
    tpu.vector_store %arg12[%c0_28, %c0_29], %14 {strides = array<i32>} : memref<16x64xf32, #tpu.memory_space<vmem>>, vector<16x64xf32>,
    return
  }
  func.func @transform_0(%arg0: i32) -> (i32, i32) {
    %c0_i32 = arith.constant 0 : i32
    %c0_i32_0 = arith.constant 0 : i32
    return %arg0, %c0_i32 : i32, i32
  }
  func.func @transform_1(%arg0: i32) -> (i32, i32) {
    %c0_i32 = arith.constant 0 : i32
    %c0_i32_0 = arith.constant 0 : i32
    return %arg0, %c0_i32 : i32, i32
  }
  func.func @transform_2(%arg0: i32) -> (i32, i32) {
    %c0_i32 = arith.constant 0 : i32
    %c0_i32_0 = arith.constant 0 : i32
    %c0_i32_1 = arith.constant 0 : i32
    return %c0_i32, %c0_i32_0 : i32, i32
  }
  func.func @transform_3(%arg0: i32) -> (i32, i32) {
    %c0_i32 = arith.constant 0 : i32
    %c0_i32_0 = arith.constant 0 : i32
    %c0_i32_1 = arith.constant 0 : i32
    return %c0_i32, %c0_i32_0 : i32, i32
  }
  func.func @transform_4(%arg0: i32) -> (i32, i32) {
    %c0_i32 = arith.constant 0 : i32
    %c0_i32_0 = arith.constant 0 : i32
    %c0_i32_1 = arith.constant 0 : i32
    return %c0_i32, %c0_i32_0 : i32, i32
  }
  func.func @transform_5(%arg0: i32) -> (i32, i32) {
    %c0_i32 = arith.constant 0 : i32
    %c0_i32_0 = arith.constant 0 : i32
    %c0_i32_1 = arith.constant 0 : i32
    return %c0_i32, %c0_i32_0 : i32, i32
  }
  func.func @transform_6(%arg0: i32) -> (i32, i32) {
    %c0_i32 = arith.constant 0 : i32
    %c0_i32_0 = arith.constant 0 : i32
    %c0_i32_1 = arith.constant 0 : i32
    return %c0_i32, %c0_i32_0 : i32, i32
  }
  func.func @transform_7(%arg0: i32) -> (i32, i32) {
    %c0_i32 = arith.constant 0 : i32
    %c0_i32_0 = arith.constant 0 : i32
    %c0_i32_1 = arith.constant 0 : i32
    return %c0_i32, %c0_i32_0 : i32, i32
  }
  func.func @transform_8(%arg0: i32) -> (i32, i32) {
    %c0_i32 = arith.constant 0 : i32
    %c0_i32_0 = arith.constant 0 : i32
    %c0_i32_1 = arith.constant 0 : i32
    return %c0_i32, %c0_i32_0 : i32, i32
  }
  func.func @transform_9(%arg0: i32) -> (i32, i32) {
    %c0_i32 = arith.constant 0 : i32
    %c0_i32_0 = arith.constant 0 : i32
    %c0_i32_1 = arith.constant 0 : i32
    return %c0_i32, %c0_i32_0 : i32, i32
  }
  func.func @transform_10(%arg0: i32) -> (i32, i32) {
    %c0_i32 = arith.constant 0 : i32
    %c0_i32_0 = arith.constant 0 : i32
    return %arg0, %c0_i32 : i32, i32
  }
  func.func @transform_11(%arg0: i32) -> (i32, i32) {
    %c0_i32 = arith.constant 0 : i32
    %c0_i32_0 = arith.constant 0 : i32
    return %arg0, %c0_i32 : i32, i32
  }
}

</mosaic_0001>

<bundles_post_ra>
// kernel: vae_forward.1
= control target key start
LH: loop header
LB: loop body
LE: loop exit
PB: predicated region body
PF: predicated region fallthrough
CT: control target
= control target key end

     0   :  { %vm1281_vm0 = vcmask 130048   ;;  %vm4099_vm1 = vcmask 523264   ;;  %s5431_s19 = smov 96   ;;  %vm2075_vm2 = vcmask 261120   ;;  %vm4093_vm3 = vcmask 125952   ;;  %s7037_s2 = inlined_call_operand.vmem [shape: bf16[784,512], index: 2, kind: input, shape index: {}]   ;;  %s7038_s0 = inlined_call_operand.vmem [shape: bf16[16,784], index: 0, kind: input, shape index: {}]   ;;  %s7039_s4 = inlined_call_operand.vmem [shape: bf16[512,64], index: 4, kind: input, shape index: {}]   ;;  %s7040_s3 = inlined_call_operand.vmem [shape: f32[1,512], index: 3, kind: input, shape index: {}]   ;;  %s7041_s5 = inlined_call_operand.vmem [shape: f32[1,64], index: 5, kind: input, shape index: {}]   ;;  %s7042_s11 = inlined_call_operand.vmem [shape: f32[16,64], index: 11, kind: output, shape index: {1}]   ;;  %s7043_s6 = inlined_call_operand.vmem [shape: bf16[32,512], index: 6, kind: input, shape index: {}]   ;;  %s7044_s8 = inlined_call_operand.vmem [shape: bf16[512,784], index: 8, kind: input, shape index: {}]   ;;  %s7045_s1 = inlined_call_operand.vmem [shape: f32[16,32], index: 1, kind: input, shape index: {}]   ;;  %s7046_s7 = inlined_call_operand.vmem [shape: f32[1,512], index: 7, kind: input, shape index: {}]   ;;  %s7047_s9 = inlined_call_operand.vmem [shape: f32[1,784], index: 9, kind: input, shape index: {}]   ;;  %s7048_s10 = inlined_call_operand.vmem [shape: bf16[16,784], index: 10, kind: output, shape index: {0}]  }
   0x1   :  { %v4702_v0 = vld [vmem:[%s7037_s2 + $0xe4] ss:$16 sps:$4 sm:$0xff]   ;;  %v4706_v2 = vld [vmem:[%s7037_s2 + $0xe0] ss:$16 sps:$4 sm:$0xff]   ;;  %v5650_v51 = vld [vmem:[%s7038_s0 + $0xc] ss:$28 sps:$4 sm:$0xff]  }
   0x2   :  { %v4704_v1 = vld [vmem:[%s7037_s2 + $0x2e4] ss:$16 sps:$4 sm:$0xff]   ;;  %1285 = vmatprep.subr.bf16.mxu0 %v4702_v0  ;;  %v4707_v3 = vld [vmem:[%s7037_s2 + $0x2e0] ss:$16 sps:$4 sm:$0xff]   ;;  %1360 = vmatprep.mubr.bf16.mxu1 %v5650_v51 }
   0x3   :  { %1328 = vmatprep.subr.bf16.mxu1 %v4704_v1  ;;  %v4708_v4 = vld [vmem:[%s7037_s2 + $0xc4] ss:$16 sps:$4 sm:$0xff]   ;;  %1286 = vmatpush1.bf16.msra.mxu0 %v4706_v2  ;;  %v4712_v6 = vld [vmem:[%s7037_s2 + $0xc0] ss:$16 sps:$4 sm:$0xff]  }
   0x4   :  { %1329 = vmatpush1.bf16.msra.mxu1 %v4707_v3  ;;  %v4710_v5 = vld [vmem:[%s7037_s2 + $0x2c4] ss:$16 sps:$4 sm:$0xff]   ;;  %1287 = vmatprep.subr.bf16.mxu0 %v4708_v4  ;;  %v4713_v7 = vld [vmem:[%s7037_s2 + $0x2c0] ss:$16 sps:$4 sm:$0xff]  }
   0x5   :  { %1330 = vmatprep.subr.bf16.mxu1 %v4710_v5  ;;  %v4714_v8 = vld [vmem:[%s7037_s2 + $0xa4] ss:$16 sps:$4 sm:$0xff]   ;;  %v4718_v10 = vld [vmem:[%s7037_s2 + $0xa0] ss:$16 sps:$4 sm:$0xff]  }
   0x6   :  { %v4716_v9 = vld [vmem:[%s7037_s2 + $0x2a4] ss:$16 sps:$4 sm:$0xff]   ;;  %v4719_v11 = vld [vmem:[%s7037_s2 + $0x2a0] ss:$16 sps:$4 sm:$0xff]  }
   0x7   :  { %1288 = vmatpush1.bf16.msra.mxu0 %v4712_v6  ;;  %v4720_v12 = vld [vmem:[%s7037_s2 + $0x84] ss:$16 sps:$4 sm:$0xff]   ;;  %v4724_v14 = vld [vmem:[%s7037_s2 + $0x80] ss:$16 sps:$4 sm:$0xff]  }
   0x8   :  { %1331 = vmatpush1.bf16.msra.mxu1 %v4713_v7  ;;  %1289 = vmatprep.subr.bf16.mxu0 %v4714_v8  ;;  %v4722_v13 = vld [vmem:[%s7037_s2 + $0x284] ss:$16 sps:$4 sm:$0xff]   ;;  %v4725_v15 = vld [vmem:[%s7037_s2 + $0x280] ss:$16 sps:$4 sm:$0xff]  }
   0x9   :  { %1332 = vmatprep.subr.bf16.mxu1 %v4716_v9  ;;  %v4726_v16 = vld [vmem:[%s7037_s2 + $0x64] ss:$16 sps:$4 sm:$0xff]   ;;  %v4730_v18 = vld [vmem:[%s7037_s2 + $0x60] ss:$16 sps:$4 sm:$0xff]   ;;  %v4815_v9 = vld [vmem:[%s7037_s2 + $0xec] ss:$16 sps:$4 sm:$0xff]  }
   0xa   :  { %v4728_v17 = vld [vmem:[%s7037_s2 + $0x264] ss:$16 sps:$4 sm:$0xff]   ;;  %v4731_v19 = vld [vmem:[%s7037_s2 + $0x260] ss:$16 sps:$4 sm:$0xff]  }
   0xb   :  { %1290 = vmatpush1.bf16.msra.mxu0 %v4718_v10  ;;  %v4732_v20 = vld [vmem:[%s7037_s2 + $0x44] ss:$16 sps:$4 sm:$0xff]   ;;  %v4736_v22 = vld [vmem:[%s7037_s2 + $0x40] ss:$16 sps:$4 sm:$0xff]  }
   0xc   :  { %1333 = vmatpush1.bf16.msra.mxu1 %v4719_v11  ;;  %1291 = vmatprep.subr.bf16.mxu0 %v4720_v12  ;;  %v4734_v21 = vld [vmem:[%s7037_s2 + $0x244] ss:$16 sps:$4 sm:$0xff]   ;;  %v4737_v23 = vld [vmem:[%s7037_s2 + $0x240] ss:$16 sps:$4 sm:$0xff]   ;;  %v5430_v11 = vmov 0  }
   0xd   :  { %1334 = vmatprep.subr.bf16.mxu1 %v4722_v13  ;;  %v4738_v24 = vld [vmem:[%s7037_s2 + $0x24] ss:$16 sps:$4 sm:$0xff]   ;;  %v4742_v26 = vld [vmem:[%s7037_s2 + $0x20] ss:$16 sps:$4 sm:$0xff]   ;;  %v4813_v13 = vld [vmem:[%s7037_s2 + $0xe8] ss:$16 sps:$4 sm:$0xff]  }
   0xe   :  { %v4740_v25 = vld [vmem:[%s7037_s2 + $0x224] ss:$16 sps:$4 sm:$0xff]   ;;  %v4743_v27 = vld [vmem:[%s7037_s2 + $0x220] ss:$16 sps:$4 sm:$0xff]  }
   0xf   :  { %1292 = vmatpush1.bf16.msra.mxu0 %v4724_v14  ;;  %v4744_v28 = vld [vmem:[%s7037_s2 + $0x4] ss:$16 sps:$4 sm:$0xff]   ;;  %v4748_v30 = vld [vmem:[%s7037_s2] ss:$16 sps:$4 sm:$0xff]  }
  0x10   :  { %1335 = vmatpush1.bf16.msra.mxu1 %v4725_v15  ;;  %1293 = vmatprep.subr.bf16.mxu0 %v4726_v16  ;;  %v4746_v29 = vld [vmem:[%s7037_s2 + $0x204] ss:$16 sps:$4 sm:$0xff]   ;;  %v4749_v31 = vld [vmem:[%s7037_s2 + $0x200] ss:$16 sps:$4 sm:$0xff]   ;;  %v4822_v16 = vld [vmem:[%s7037_s2 + $0xcc] ss:$16 sps:$4 sm:$0xff]  }
  0x11   :  { %1336 = vmatprep.subr.bf16.mxu1 %v4728_v17  ;;  %v4750_v32 = vld [vmem:[%s7037_s2 + $0x1e4] ss:$16 sps:$4 sm:$0xff]   ;;  %v4754_v34 = vld [vmem:[%s7037_s2 + $0x1e0] ss:$16 sps:$4 sm:$0xff]  }
  0x12   :  { %v4752_v33 = vld [vmem:[%s7037_s2 + $0x3e4] ss:$16 sps:$4 sm:$0xff]   ;;  %v4755_v35 = vld [vmem:[%s7037_s2 + $0x3e0] ss:$16 sps:$4 sm:$0xff]  }
  0x13   :  { %1294 = vmatpush1.bf16.msra.mxu0 %v4730_v18  ;;  %v4756_v36 = vld [vmem:[%s7037_s2 + $0x1c4] ss:$16 sps:$4 sm:$0xff]   ;;  %v4760_v38 = vld [vmem:[%s7037_s2 + $0x1c0] ss:$16 sps:$4 sm:$0xff]   ;;  %v4820_v18 = vld [vmem:[%s7037_s2 + $0xc8] ss:$16 sps:$4 sm:$0xff]  }
  0x14   :  { %1337 = vmatpush1.bf16.msra.mxu1 %v4731_v19  ;;  %1295 = vmatprep.subr.bf16.mxu0 %v4732_v20  ;;  %v4758_v37 = vld [vmem:[%s7037_s2 + $0x3c4] ss:$16 sps:$4 sm:$0xff]   ;;  %v4761_v39 = vld [vmem:[%s7037_s2 + $0x3c0] ss:$16 sps:$4 sm:$0xff]   ;;  %v4828_v20 = vld [vmem:[%s7037_s2 + $0xac] ss:$16 sps:$4 sm:$0xff]  }
  0x15   :  { %1338 = vmatprep.subr.bf16.mxu1 %v4734_v21  ;;  %v4762_v40 = vld [vmem:[%s7037_s2 + $0x1a4] ss:$16 sps:$4 sm:$0xff]   ;;  %v4766_v42 = vld [vmem:[%s7037_s2 + $0x1a0] ss:$16 sps:$4 sm:$0xff]  }
  0x16   :  { %v4764_v41 = vld [vmem:[%s7037_s2 + $0x3a4] ss:$16 sps:$4 sm:$0xff]   ;;  %v4767_v43 = vld [vmem:[%s7037_s2 + $0x3a0] ss:$16 sps:$4 sm:$0xff]  }
  0x17   :  { %1296 = vmatpush1.bf16.msra.mxu0 %v4736_v22  ;;  %v4768_v44 = vld [vmem:[%s7037_s2 + $0x184] ss:$16 sps:$4 sm:$0xff]   ;;  %v4772_v46 = vld [vmem:[%s7037_s2 + $0x180] ss:$16 sps:$4 sm:$0xff]   ;;  %v4826_v22 = vld [vmem:[%s7037_s2 + $0xa8] ss:$16 sps:$4 sm:$0xff]  }
  0x18   :  { %1339 = vmatpush1.bf16.msra.mxu1 %v4737_v23  ;;  %1297 = vmatprep.subr.bf16.mxu0 %v4738_v24  ;;  %v4770_v45 = vld [vmem:[%s7037_s2 + $0x384] ss:$16 sps:$4 sm:$0xff]   ;;  %v4773_v47 = vld [vmem:[%s7037_s2 + $0x380] ss:$16 sps:$4 sm:$0xff]   ;;  %v4834_v24 = vld [vmem:[%s7037_s2 + $0x8c] ss:$16 sps:$4 sm:$0xff]  }
  0x19   :  { %1340 = vmatprep.subr.bf16.mxu1 %v4740_v25  ;;  %v4774_v48 = vld [vmem:[%s7037_s2 + $0x164] ss:$16 sps:$4 sm:$0xff]   ;;  %v4778_v52 = vld [vmem:[%s7037_s2 + $0x160] ss:$16 sps:$4 sm:$0xff]  }
  0x1a   :  { %v5642_v49 = vld [vmem:[%s7038_s0 + $0x4] ss:$28 sps:$4 sm:$0xff]   ;;  %v5739_v14 = vld [vmem:[%s7038_s0 + $0x18] ss:$28 sps:$4 sm:$0xff]  }
  0x1b   :  { %1298 = vmatpush1.bf16.msra.mxu0 %v4742_v26  ;;  %v4776_v50 = vld [vmem:[%s7037_s2 + $0x364] ss:$16 sps:$4 sm:$0xff]   ;;  %1317 = vmatprep.mubr.bf16.mxu0 %v5642_v49  ;;  %v4779_v53 = vld [vmem:[%s7037_s2 + $0x360] ss:$16 sps:$4 sm:$0xff]   ;;  %v4832_v26 = vld [vmem:[%s7037_s2 + $0x88] ss:$16 sps:$4 sm:$0xff]  }
  0x1c   :  { %1341 = vmatpush1.bf16.msra.mxu1 %v4743_v27  ;;  %1299 = vmatprep.subr.bf16.mxu0 %v4744_v28  ;;  %v4780_v54 = vld [vmem:[%s7037_s2 + $0x144] ss:$16 sps:$4 sm:$0xff]   ;;  %v4784_v56 = vld [vmem:[%s7037_s2 + $0x140] ss:$16 sps:$4 sm:$0xff]   ;;  %v4840_v28 = vld [vmem:[%s7037_s2 + $0x6c] ss:$16 sps:$4 sm:$0xff]  }
  0x1d   :  { %1342 = vmatprep.subr.bf16.mxu1 %v4746_v29  ;;  %v4782_v55 = vld [vmem:[%s7037_s2 + $0x344] ss:$16 sps:$4 sm:$0xff]   ;;  %v4785_v57 = vld [vmem:[%s7037_s2 + $0x340] ss:$16 sps:$4 sm:$0xff]  }
  0x1e   :  { %v4786_v58 = vld [vmem:[%s7037_s2 + $0x124] ss:$16 sps:$4 sm:$0xff]   ;;  %v4790_v60 = vld [vmem:[%s7037_s2 + $0x120] ss:$16 sps:$4 sm:$0xff]  }
  0x1f   :  { %1300 = vmatpush1.bf16.msra.mxu0 %v4748_v30  ;;  %v4788_v59 = vld [vmem:[%s7037_s2 + $0x324] ss:$16 sps:$4 sm:$0xff]   ;;  %v4791_v61 = vld [vmem:[%s7037_s2 + $0x320] ss:$16 sps:$4 sm:$0xff]   ;;  %v4838_v30 = vld [vmem:[%s7037_s2 + $0x68] ss:$16 sps:$4 sm:$0xff]  }
  0x20   :  { %1343 = vmatpush1.bf16.msra.mxu1 %v4749_v31  ;;  %1301 = vmatprep.subr.bf16.mxu0 %v4750_v32  ;;  %v4792_v62 = vld [vmem:[%s7037_s2 + $0x104] ss:$16 sps:$4 sm:$0xff]   ;;  %v4796_v0 = vld [vmem:[%s7037_s2 + $0x100] ss:$16 sps:$4 sm:$0xff]   ;;  %v4846_v32 = vld [vmem:[%s7037_s2 + $0x4c] ss:$16 sps:$4 sm:$0xff]  }
  0x21   :  { %1344 = vmatprep.subr.bf16.mxu1 %v4752_v33  ;;  %v4794_v63 = vld [vmem:[%s7037_s2 + $0x304] ss:$16 sps:$4 sm:$0xff]   ;;  %v4797_v1 = vld [vmem:[%s7037_s2 + $0x300] ss:$16 sps:$4 sm:$0xff]  }
  0x22   :  { %v4806_v2 = vld [vmem:[%s7037_s2 + $0x4e4] ss:$16 sps:$4 sm:$0xff]   ;;  %v5705_v4 = vld [vmem:[%s7038_s0] ss:$28 sps:$4 sm:$0xff]  }
  0x23   :  { %1302 = vmatpush2.bf16.msra.mxu0 %v4754_v34  ;;  %v4809_v3 = vld [vmem:[%s7037_s2 + $0x604] ss:$16 sps:$4 sm:$0xff]   ;;  %v4804_v6 = vld [vmem:[%s7037_s2 + $0x4e0] ss:$16 sps:$4 sm:$0xff]  }
  0x24   :  { %1345 = vmatpush2.bf16.msra.mxu1 %v4755_v35  ;;  %1303 = vmatprep.subr.bf16.mxu0 %v4756_v36  ;;  %v5710_v5 = vld [vmem:[%s7038_s0 + $0x8] ss:$28 sps:$4 sm:$0xff]   ;;  %v4807_v7 = vld [vmem:[%s7037_s2 + $0x600] ss:$16 sps:$4 sm:$0xff]  }
  0x25   :  { %1346 = vmatprep.subr.bf16.mxu1 %v4758_v37  ;;  %v4812_v8 = vld [vmem:[%s7037_s2 + $0x4c4] ss:$16 sps:$4 sm:$0xff]   ;;  %v4810_v10 = vld [vmem:[%s7037_s2 + $0x4c0] ss:$16 sps:$4 sm:$0xff]   ;;  %v4844_v35 = vld [vmem:[%s7037_s2 + $0x48] ss:$16 sps:$4 sm:$0xff]  }
  0x26   :  { %v4818_v12 = vld [vmem:[%s7037_s2 + $0x4a4] ss:$16 sps:$4 sm:$0xff]   ;;  %v4816_v15 = vld [vmem:[%s7037_s2 + $0x4a0] ss:$16 sps:$4 sm:$0xff]   ;;  %v4852_v37 = vld [vmem:[%s7037_s2 + $0x2c] ss:$16 sps:$4 sm:$0xff]  }
  0x27   :  { %1304 = vmatpush2.bf16.msra.mxu0 %v4760_v38  ;;  %v4825_v17 = vld [vmem:[%s7037_s2 + $0x484] ss:$16 sps:$4 sm:$0xff]   ;;  %v4823_v19 = vld [vmem:[%s7037_s2 + $0x480] ss:$16 sps:$4 sm:$0xff]  }
  0x28   :  { %1347 = vmatpush2.bf16.msra.mxu1 %v4761_v39  ;;  %1305 = vmatprep.subr.bf16.mxu0 %v4762_v40  ;;  %v4831_v21 = vld [vmem:[%s7037_s2 + $0x464] ss:$16 sps:$4 sm:$0xff]   ;;  %v4829_v23 = vld [vmem:[%s7037_s2 + $0x460] ss:$16 sps:$4 sm:$0xff]   ;;  %v4850_v39 = vld [vmem:[%s7037_s2 + $0x28] ss:$16 sps:$4 sm:$0xff]  }
  0x29   :  { %1348 = vmatprep.subr.bf16.mxu1 %v4764_v41  ;;  %v4837_v25 = vld [vmem:[%s7037_s2 + $0x444] ss:$16 sps:$4 sm:$0xff]   ;;  %v4835_v27 = vld [vmem:[%s7037_s2 + $0x440] ss:$16 sps:$4 sm:$0xff]   ;;  %v4858_v41 = vld [vmem:[%s7037_s2 + $0xc] ss:$16 sps:$4 sm:$0xff]  }
  0x2a   :  { %v4843_v29 = vld [vmem:[%s7037_s2 + $0x424] ss:$16 sps:$4 sm:$0xff]   ;;  %v4841_v31 = vld [vmem:[%s7037_s2 + $0x420] ss:$16 sps:$4 sm:$0xff]  }
  0x2b   :  { %1306 = vmatpush2.bf16.msra.mxu0 %v4766_v42  ;;  %v5801_v33 = vld [vmem:[%s7038_s0 + $0x14] ss:$28 sps:$4 sm:$0xff]  }
  0x2c   :  { %1349 = vmatpush2.bf16.msra.mxu1 %v4767_v43  ;;  %1307 = vmatprep.subr.bf16.mxu0 %v4768_v44  ;;  %v4849_v34 = vld [vmem:[%s7037_s2 + $0x404] ss:$16 sps:$4 sm:$0xff]   ;;  %v4847_v36 = vld [vmem:[%s7037_s2 + $0x400] ss:$16 sps:$4 sm:$0xff]   ;;  %v4856_v43 = vld [vmem:[%s7037_s2 + $0x8] ss:$16 sps:$4 sm:$0xff]  }
  0x2d   :  { %1350 = vmatprep.subr.bf16.mxu1 %v4770_v45  ;;  %v4855_v38 = vld [vmem:[%s7037_s2 + $0x5e4] ss:$16 sps:$4 sm:$0xff]   ;;  %v4853_v40 = vld [vmem:[%s7037_s2 + $0x5e0] ss:$16 sps:$4 sm:$0xff]   ;;  %v4864_v45 = vld [vmem:[%s7037_s2 + $0x1ec] ss:$16 sps:$4 sm:$0xff]  }
  0x2e   :  { %v4861_v42 = vld [vmem:[%s7037_s2 + $0x5c4] ss:$16 sps:$4 sm:$0xff]   ;;  %v4859_v44 = vld [vmem:[%s7037_s2 + $0x5c0] ss:$16 sps:$4 sm:$0xff]  }
  0x2f   :  { %1308 = vmatpush2.bf16.msra.mxu0 %v4772_v46  ;;  %v4867_v46 = vld [vmem:[%s7037_s2 + $0x5a4] ss:$16 sps:$4 sm:$0xff]  }
  0x30   :  { %1351 = vmatpush2.bf16.msra.mxu1 %v4773_v47  ;;  %1309 = vmatprep.subr.bf16.mxu0 %v4774_v48  ;;  %v4862_v47 = vld [vmem:[%s7037_s2 + $0x1e8] ss:$16 sps:$4 sm:$0xff]   ;;  %v4865_v48 = vld [vmem:[%s7037_s2 + $0x5a0] ss:$16 sps:$4 sm:$0xff]  }
  0x31   :  { %1352 = vmatprep.subr.bf16.mxu1 %v4776_v50  ;;  %v4873_v50 = vld [vmem:[%s7037_s2 + $0x584] ss:$16 sps:$4 sm:$0xff]  }
  0x33   :  { %1310 = vmatpush2.bf16.msra.mxu0 %v4778_v52  ;;  %v4868_v52 = vld [vmem:[%s7037_s2 + $0x1c8] ss:$16 sps:$4 sm:$0xff]  }
  0x34   :  { %1353 = vmatpush2.bf16.msra.mxu1 %v4779_v53  ;;  %1311 = vmatprep.subr.bf16.mxu0 %v4780_v54  ;;  %v4871_v53 = vld [vmem:[%s7037_s2 + $0x580] ss:$16 sps:$4 sm:$0xff]   ;;  %v4876_v54 = vld [vmem:[%s7037_s2 + $0x1ac] ss:$16 sps:$4 sm:$0xff]  }
  0x35   :  { %1354 = vmatprep.subr.bf16.mxu1 %v4782_v55  ;;  %v4879_v55 = vld [vmem:[%s7037_s2 + $0x564] ss:$16 sps:$4 sm:$0xff]  }
  0x37   :  { %1312 = vmatpush2.bf16.msra.mxu0 %v4784_v56  ;;  %v4874_v56 = vld [vmem:[%s7037_s2 + $0x1a8] ss:$16 sps:$4 sm:$0xff]  }
  0x38   :  { %1355 = vmatpush2.bf16.msra.mxu1 %v4785_v57  ;;  %1313 = vmatprep.subr.bf16.mxu0 %v4786_v58  ;;  %v4877_v57 = vld [vmem:[%s7037_s2 + $0x560] ss:$16 sps:$4 sm:$0xff]   ;;  %v4882_v58 = vld [vmem:[%s7037_s2 + $0x18c] ss:$16 sps:$4 sm:$0xff]  }
  0x39   :  { %1356 = vmatprep.subr.bf16.mxu1 %v4788_v59  ;;  %v4885_v59 = vld [vmem:[%s7037_s2 + $0x544] ss:$16 sps:$4 sm:$0xff]  }
  0x3b   :  { %1314 = vmatpush2.bf16.msra.mxu0 %v4790_v60  ;;  %v4880_v60 = vld [vmem:[%s7037_s2 + $0x188] ss:$16 sps:$4 sm:$0xff]  }
  0x3c   :  { %1357 = vmatpush2.bf16.msra.mxu1 %v4791_v61  ;;  %1315 = vmatprep.subr.bf16.mxu0 %v4792_v62  ;;  %v4883_v61 = vld [vmem:[%s7037_s2 + $0x540] ss:$16 sps:$4 sm:$0xff]   ;;  %v4888_v62 = vld [vmem:[%s7037_s2 + $0x16c] ss:$16 sps:$4 sm:$0xff]  }
  0x3d   :  { %1358 = vmatprep.subr.bf16.mxu1 %v4794_v63  ;;  %v4891_v63 = vld [vmem:[%s7037_s2 + $0x524] ss:$16 sps:$4 sm:$0xff]  }
  0x3f   :  { %1316 = vmatpush2.bf16.msra.mxu0 %v4796_v0  ;;  %v4886_v0 = vld [vmem:[%s7037_s2 + $0x168] ss:$16 sps:$4 sm:$0xff]  }
  0x40   :  { %1359 = vmatpush2.bf16.msra.mxu1 %v4797_v1  ;;  %1371 = vmatprep.subr.bf16.mxu0 %v4806_v2  ;;  %v4889_v1 = vld [vmem:[%s7037_s2 + $0x520] ss:$16 sps:$4 sm:$0xff]   ;;  %v4894_v2 = vld [vmem:[%s7037_s2 + $0x14c] ss:$16 sps:$4 sm:$0xff]  }
  0x41   :  { %1428 = vmatprep.subr.bf16.mxu1 %v4809_v3  ;;  %v4897_v3 = vld [vmem:[%s7037_s2 + $0x504] ss:$16 sps:$4 sm:$0xff]  }
  0x42   :  { %1318 = vmatmul.mubr.bf16.vlgmr.msra.gmra.mxu0 %v5705_v4 }
  0x43   :  { %1361 = vmatmul.mubr.bf16.vlgmr.msra.gmra.mxu1 %v5710_v5  ;;  %1372 = vmatpush1.bf16.msra.mxu0 %v4804_v6  ;;  %v4892_v6 = vld [vmem:[%s7037_s2 + $0x148] ss:$16 sps:$4 sm:$0xff]  }
  0x44   :  { %1429 = vmatpush1.bf16.msra.mxu1 %v4807_v7  ;;  %1373 = vmatprep.subr.bf16.mxu0 %v4812_v8  ;;  %v4895_v7 = vld [vmem:[%s7037_s2 + $0x500] ss:$16 sps:$4 sm:$0xff]   ;;  %v4903_v8 = vld [vmem:[%s7037_s2 + $0x12c] ss:$16 sps:$4 sm:$0xff]  }
  0x45   :  { %1446 = vmatprep.mubr.bf16.mxu1 %v5430_v11  ;;  %1457 = vmatprep.subr.bf16.mxu1 %v4815_v9  ;;  %v4906_v9 = vld [vmem:[%s7037_s2 + $0x2ec] ss:$16 sps:$4 sm:$0xff]  }
  0x46   :  { %1403 = vmatprep.mubr.bf16.mxu0 %v5801_v33 }
  0x47   :  { %1374 = vmatpush1.bf16.msra.mxu0 %v4810_v10  ;;  %v5918_v10 = vld [vmem:[%s7038_s0 + $0x10] ss:$28 sps:$4 sm:$0xff]  }
  0x48   :  { %1375 = vmatprep.subr.bf16.mxu0 %v4818_v12  ;;  %v4901_v12 = vld [vmem:[%s7037_s2 + $0x128] ss:$16 sps:$4 sm:$0xff]  }
  0x4b   :  { %4313 = vmatmul.mubr.msk.bf16.vlgmr.msra.gmra.mxu1 %vm1281_vm0, %v5739_v14  ;;  %1376 = vmatpush1.bf16.msra.mxu0 %v4816_v15  ;;  %v4909_v15 = vld [vmem:[%s7037_s2 + $0x10c] ss:$16 sps:$4 sm:$0xff]  }
  0x4c   :  { %1458 = vmatpush1.bf16.msra.mxu1 %v4813_v13  ;;  %1377 = vmatprep.subr.bf16.mxu0 %v4825_v17  ;;  %v4904_v13 = vld [vmem:[%s7037_s2 + $0x2e8] ss:$16 sps:$4 sm:$0xff]  }
  0x4d   :  { %1459 = vmatprep.subr.bf16.mxu1 %v4822_v16  ;;  %1489 = vmatprep.mubr.bf16.mxu1 %v5642_v49  ;;  %v4870_v49 = vld [vmem:[%s7037_s2 + $0x1cc] ss:$16 sps:$4 sm:$0xff]   ;;  %v4907_v17 = vld [vmem:[%s7037_s2 + $0x108] ss:$16 sps:$4 sm:$0xff]  }
  0x4e   :  { %v4912_v16 = vld [vmem:[%s7037_s2 + $0x2cc] ss:$16 sps:$4 sm:$0xff]  }
  0x4f   :  { %1378 = vmatpush1.bf16.msra.mxu0 %v4823_v19  ;;  %v4915_v19 = vld [vmem:[%s7037_s2 + $0x4ec] ss:$16 sps:$4 sm:$0xff]  }
  0x50   :  { %1460 = vmatpush1.bf16.msra.mxu1 %v4820_v18  ;;  %1379 = vmatprep.subr.bf16.mxu0 %v4831_v21  ;;  %v4910_v18 = vld [vmem:[%s7037_s2 + $0x2c8] ss:$16 sps:$4 sm:$0xff]  }
  0x51   :  { %1461 = vmatprep.subr.bf16.mxu1 %v4828_v20  ;;  %v4918_v20 = vld [vmem:[%s7037_s2 + $0x2ac] ss:$16 sps:$4 sm:$0xff]   ;;  %v4913_v21 = vld [vmem:[%s7037_s2 + $0x4e8] ss:$16 sps:$4 sm:$0xff]  }
  0x53   :  { %1380 = vmatpush1.bf16.msra.mxu0 %v4829_v23  ;;  %v4921_v23 = vld [vmem:[%s7037_s2 + $0x4cc] ss:$16 sps:$4 sm:$0xff]  }
  0x54   :  { %1462 = vmatpush1.bf16.msra.mxu1 %v4826_v22  ;;  %1381 = vmatprep.subr.bf16.mxu0 %v4837_v25  ;;  %v4916_v22 = vld [vmem:[%s7037_s2 + $0x2a8] ss:$16 sps:$4 sm:$0xff]  }
  0x55   :  { %1463 = vmatprep.subr.bf16.mxu1 %v4834_v24  ;;  %v4919_v24 = vld [vmem:[%s7037_s2 + $0x4c8] ss:$16 sps:$4 sm:$0xff]  }
  0x56   :  { %v4922_v25 = vld [vmem:[%s7037_s2 + $0x288] ss:$16 sps:$4 sm:$0xff]  }
  0x57   :  { %1382 = vmatpush1.bf16.msra.mxu0 %v4835_v27  ;;  %v4925_v27 = vld [vmem:[%s7037_s2 + $0x4a8] ss:$16 sps:$4 sm:$0xff]  }
  0x58   :  { %1464 = vmatpush1.bf16.msra.mxu1 %v4832_v26  ;;  %1383 = vmatprep.subr.bf16.mxu0 %v4843_v29  ;;  %v4927_v26 = vld [vmem:[%s7037_s2 + $0x4ac] ss:$16 sps:$4 sm:$0xff]  }
  0x59   :  { %1465 = vmatprep.subr.bf16.mxu1 %v4840_v28  ;;  %v4928_v28 = vld [vmem:[%s7037_s2 + $0x268] ss:$16 sps:$4 sm:$0xff]   ;;  %v4933_v29 = vld [vmem:[%s7037_s2 + $0x48c] ss:$16 sps:$4 sm:$0xff]  }
  0x5b   :  { %1384 = vmatpush1.bf16.msra.mxu0 %v4841_v31  ;;  %v4931_v31 = vld [vmem:[%s7037_s2 + $0x488] ss:$16 sps:$4 sm:$0xff]  }
  0x5c   :  { %1466 = vmatpush1.bf16.msra.mxu1 %v4838_v30  ;;  %1385 = vmatprep.subr.bf16.mxu0 %v4849_v34  ;;  %v4936_v30 = vld [vmem:[%s7037_s2 + $0x24c] ss:$16 sps:$4 sm:$0xff]  }
  0x5d   :  { %1467 = vmatprep.subr.bf16.mxu1 %v4846_v32  ;;  %v4934_v32 = vld [vmem:[%s7037_s2 + $0x248] ss:$16 sps:$4 sm:$0xff]   ;;  %v4942_v34 = vld [vmem:[%s7037_s2 + $0x22c] ss:$16 sps:$4 sm:$0xff]  }
  0x5f   :  { %1386 = vmatpush1.bf16.msra.mxu0 %v4847_v36  ;;  %v4940_v36 = vld [vmem:[%s7037_s2 + $0x228] ss:$16 sps:$4 sm:$0xff]  }
  0x60   :  { %1468 = vmatpush1.bf16.msra.mxu1 %v4844_v35  ;;  %1387 = vmatprep.subr.bf16.mxu0 %v4855_v38  ;;  %v4937_v35 = vld [vmem:[%s7037_s2 + $0x468] ss:$16 sps:$4 sm:$0xff]   ;;  %v4948_v38 = vld [vmem:[%s7037_s2 + $0x20c] ss:$16 sps:$4 sm:$0xff]  }
  0x61   :  { %1469 = vmatprep.subr.bf16.mxu1 %v4852_v37  ;;  %v4945_v37 = vld [vmem:[%s7037_s2 + $0x44c] ss:$16 sps:$4 sm:$0xff]  }
  0x63   :  { %1388 = vmatpush2.bf16.msra.mxu0 %v4853_v40  ;;  %v4946_v40 = vld [vmem:[%s7037_s2 + $0x208] ss:$16 sps:$4 sm:$0xff]  }
  0x64   :  { %1470 = vmatpush1.bf16.msra.mxu1 %v4850_v39  ;;  %1389 = vmatprep.subr.bf16.mxu0 %v4861_v42  ;;  %v4943_v39 = vld [vmem:[%s7037_s2 + $0x448] ss:$16 sps:$4 sm:$0xff]   ;;  %v4954_v42 = vld [vmem:[%s7037_s2 + $0x3ec] ss:$16 sps:$4 sm:$0xff]  }
  0x65   :  { %1471 = vmatprep.subr.bf16.mxu1 %v4858_v41  ;;  %v4951_v41 = vld [vmem:[%s7037_s2 + $0x42c] ss:$16 sps:$4 sm:$0xff]  }
  0x67   :  { %1390 = vmatpush2.bf16.msra.mxu0 %v4859_v44  ;;  %v4952_v44 = vld [vmem:[%s7037_s2 + $0x3e8] ss:$16 sps:$4 sm:$0xff]  }
  0x68   :  { %1472 = vmatpush1.bf16.msra.mxu1 %v4856_v43  ;;  %1391 = vmatprep.subr.bf16.mxu0 %v4867_v46  ;;  %v4949_v43 = vld [vmem:[%s7037_s2 + $0x428] ss:$16 sps:$4 sm:$0xff]   ;;  %v4960_v46 = vld [vmem:[%s7037_s2 + $0x3cc] ss:$16 sps:$4 sm:$0xff]  }
  0x69   :  { %1473 = vmatprep.subr.bf16.mxu1 %v4864_v45  ;;  %v4957_v45 = vld [vmem:[%s7037_s2 + $0x40c] ss:$16 sps:$4 sm:$0xff]  }
  0x6b   :  { %1392 = vmatpush2.bf16.msra.mxu0 %v4865_v48  ;;  %v4958_v48 = vld [vmem:[%s7037_s2 + $0x3c8] ss:$16 sps:$4 sm:$0xff]  }
  0x6c   :  { %1474 = vmatpush2.bf16.msra.mxu1 %v4862_v47  ;;  %1393 = vmatprep.subr.bf16.mxu0 %v4873_v50  ;;  %v4955_v47 = vld [vmem:[%s7037_s2 + $0x408] ss:$16 sps:$4 sm:$0xff]   ;;  %v4966_v50 = vld [vmem:[%s7037_s2 + $0x3ac] ss:$16 sps:$4 sm:$0xff]  }
  0x6d   :  { %1475 = vmatprep.subr.bf16.mxu1 %v4870_v49  ;;  %v4963_v49 = vld [vmem:[%s7037_s2 + $0x5ec] ss:$16 sps:$4 sm:$0xff]  }
  0x6f   :  { %1394 = vmatpush2.bf16.msra.mxu0 %v4871_v53  ;;  %v4964_v53 = vld [vmem:[%s7037_s2 + $0x3a8] ss:$16 sps:$4 sm:$0xff]  }
  0x70   :  { %1476 = vmatpush2.bf16.msra.mxu1 %v4868_v52  ;;  %1395 = vmatprep.subr.bf16.mxu0 %v4879_v55  ;;  %v4961_v52 = vld [vmem:[%s7037_s2 + $0x5e8] ss:$16 sps:$4 sm:$0xff]   ;;  %v4972_v55 = vld [vmem:[%s7037_s2 + $0x38c] ss:$16 sps:$4 sm:$0xff]  }
  0x71   :  { %1477 = vmatprep.subr.bf16.mxu1 %v4876_v54  ;;  %v4969_v54 = vld [vmem:[%s7037_s2 + $0x5cc] ss:$16 sps:$4 sm:$0xff]  }
  0x73   :  { %1396 = vmatpush2.bf16.msra.mxu0 %v4877_v57  ;;  %v4970_v57 = vld [vmem:[%s7037_s2 + $0x388] ss:$16 sps:$4 sm:$0xff]  }
  0x74   :  { %1478 = vmatpush2.bf16.msra.mxu1 %v4874_v56  ;;  %1397 = vmatprep.subr.bf16.mxu0 %v4885_v59  ;;  %v4967_v56 = vld [vmem:[%s7037_s2 + $0x5c8] ss:$16 sps:$4 sm:$0xff]   ;;  %v4978_v59 = vld [vmem:[%s7037_s2 + $0x36c] ss:$16 sps:$4 sm:$0xff]  }
  0x75   :  { %1479 = vmatprep.subr.bf16.mxu1 %v4882_v58  ;;  %v4975_v58 = vld [vmem:[%s7037_s2 + $0x5ac] ss:$16 sps:$4 sm:$0xff]  }
  0x77   :  { %1398 = vmatpush2.bf16.msra.mxu0 %v4883_v61  ;;  %v4976_v61 = vld [vmem:[%s7037_s2 + $0x368] ss:$16 sps:$4 sm:$0xff]  }
  0x78   :  { %1480 = vmatpush2.bf16.msra.mxu1 %v4880_v60  ;;  %1399 = vmatprep.subr.bf16.mxu0 %v4891_v63  ;;  %v4973_v60 = vld [vmem:[%s7037_s2 + $0x5a8] ss:$16 sps:$4 sm:$0xff]   ;;  %v4984_v63 = vld [vmem:[%s7037_s2 + $0x34c] ss:$16 sps:$4 sm:$0xff]  }
  0x79   :  { %1481 = vmatprep.subr.bf16.mxu1 %v4888_v62  ;;  %v4981_v62 = vld [vmem:[%s7037_s2 + $0x58c] ss:$16 sps:$4 sm:$0xff]  }
  0x7b   :  { %1400 = vmatpush2.bf16.msra.mxu0 %v4889_v1  ;;  %v4982_v1 = vld [vmem:[%s7037_s2 + $0x348] ss:$16 sps:$4 sm:$0xff]  }
  0x7c   :  { %1482 = vmatpush2.bf16.msra.mxu1 %v4886_v0  ;;  %1401 = vmatprep.subr.bf16.mxu0 %v4897_v3  ;;  %v4979_v0 = vld [vmem:[%s7037_s2 + $0x588] ss:$16 sps:$4 sm:$0xff]   ;;  %v4990_v3 = vld [vmem:[%s7037_s2 + $0x32c] ss:$16 sps:$4 sm:$0xff]  }
  0x7d   :  { %1483 = vmatprep.subr.bf16.mxu1 %v4894_v2  ;;  %v4987_v2 = vld [vmem:[%s7037_s2 + $0x56c] ss:$16 sps:$4 sm:$0xff]  }
  0x7f   :  { %1402 = vmatpush2.bf16.msra.mxu0 %v4895_v7  ;;  %v4988_v7 = vld [vmem:[%s7037_s2 + $0x328] ss:$16 sps:$4 sm:$0xff]  }
  0x80   :  { %1484 = vmatpush2.bf16.msra.mxu1 %v4892_v6  ;;  %1500 = vmatprep.subr.bf16.mxu0 %v4906_v9  ;;  %v4985_v6 = vld [vmem:[%s7037_s2 + $0x568] ss:$16 sps:$4 sm:$0xff]   ;;  %v4996_v9 = vld [vmem:[%s7037_s2 + $0x30c] ss:$16 sps:$4 sm:$0xff]  }
  0x81   :  { %1485 = vmatprep.subr.bf16.mxu1 %v4903_v8  ;;  %v4993_v8 = vld [vmem:[%s7037_s2 + $0x54c] ss:$16 sps:$4 sm:$0xff]  }
  0x82   :  { %1404 = vmatmul.mubr.bf16.vlgmr.msra.gmra.mxu0 %v5918_v10 }
  0x83   :  { %1501 = vmatpush1.bf16.msra.mxu0 %v4904_v13  ;;  %1532 = vmatprep.mubr.bf16.mxu0 %v5650_v51  ;;  %v4924_v51 = vld [vmem:[%s7037_s2 + $0x28c] ss:$16 sps:$4 sm:$0xff]   ;;  %v4994_v13 = vld [vmem:[%s7037_s2 + $0x308] ss:$16 sps:$4 sm:$0xff]  }
  0x84   :  { %1486 = vmatpush2.bf16.msra.mxu1 %v4901_v12  ;;  %1502 = vmatprep.subr.bf16.mxu0 %v4912_v16  ;;  %v4991_v12 = vld [vmem:[%s7037_s2 + $0x548] ss:$16 sps:$4 sm:$0xff]   ;;  %v5002_v16 = vld [vmem:[%s7037_s2 + $0x60c] ss:$16 sps:$4 sm:$0xff]  }
  0x85   :  { %1487 = vmatprep.subr.bf16.mxu1 %v4909_v15  ;;  %v4999_v15 = vld [vmem:[%s7037_s2 + $0x52c] ss:$16 sps:$4 sm:$0xff]  }
  0x87   :  { %1503 = vmatpush1.bf16.msra.mxu0 %v4910_v18  ;;  %v5000_v18 = vld [vmem:[%s7037_s2 + $0x608] ss:$16 sps:$4 sm:$0xff]  }
  0x88   :  { %1488 = vmatpush2.bf16.msra.mxu1 %v4907_v17  ;;  %1504 = vmatprep.subr.bf16.mxu0 %v4918_v20  ;;  %v4997_v17 = vld [vmem:[%s7037_s2 + $0x528] ss:$16 sps:$4 sm:$0xff]  }
  0x89   :  { %1543 = vmatprep.subr.bf16.mxu1 %v4915_v19  ;;  %v5005_v19 = vld [vmem:[%s7037_s2 + $0x50c] ss:$16 sps:$4 sm:$0xff]  }
  0x8a   :  { %v5006_v20 = vld [vmem:[%s7039_s4 + $0x78] sm:$0xff]  }
  0x8b   :  { %1490 = vmatmul.mubr.bf16.vlgmr.msra.gmra.mxu1 %v5705_v4  ;;  %1505 = vmatpush1.bf16.msra.mxu0 %v4916_v22  ;;  %v4930_v4 = vld [vmem:[%s7037_s2 + $0x26c] ss:$16 sps:$4 sm:$0xff]  }
  0x8c   :  { %1544 = vmatpush1.bf16.msra.mxu1 %v4913_v21  ;;  %1506 = vmatprep.subr.bf16.mxu0 %v4924_v51  ;;  %v5003_v21 = vld [vmem:[%s7037_s2 + $0x508] ss:$16 sps:$4 sm:$0xff]  }
  0x8d   :  { %1545 = vmatprep.subr.bf16.mxu1 %v4921_v23  ;;  %1575 = vmatprep.mubr.bf16.mxu1 %v5801_v33  ;;  %v4939_v33 = vld [vmem:[%s7037_s2 + $0x46c] ss:$16 sps:$4 sm:$0xff]   ;;  %v5008_v23 = vld [vmem:[%s7039_s4 + $0x70] sm:$0xff]  }
  0x8e   :  { %v5007_v22 = vld [vmem:[%s7039_s4 + $0x38] sm:$0xff]   ;;  %v5010_v51 = vld [vmem:[%s7039_s4 + $0x68] sm:$0xff]  }
  0x8f   :  { %1507 = vmatpush1.bf16.msra.mxu0 %v4922_v25  ;;  %v5023_v25 = vld [vmem:[%s7039_s4 + $0xb8] sm:$0xff]  }
  0x90   :  { %1546 = vmatpush1.bf16.msra.mxu1 %v4919_v24  ;;  %1508 = vmatprep.subr.bf16.mxu0 %v4930_v4  ;;  %v5011_v24 = vld [vmem:[%s7039_s4 + $0x28] sm:$0xff]   ;;  %v5013_v4 = vld [vmem:[%s7039_s4 + $0x20] sm:$0xff]  }
  0x91   :  { %1547 = vmatprep.subr.bf16.mxu1 %v4927_v26  ;;  %v5024_v26 = vld [vmem:[%s7039_s4 + $0xf0] sm:$0xff]  }
  0x93   :  { %1509 = vmatpush1.bf16.msra.mxu0 %v4928_v28  ;;  %v5025_v28 = vld [vmem:[%s7039_s4 + $0xb0] sm:$0xff]  }
  0x94   :  { %1548 = vmatpush1.bf16.msra.mxu1 %v4925_v27  ;;  %1510 = vmatprep.subr.bf16.mxu0 %v4936_v30  ;;  %v5014_v27 = vld [vmem:[%s7039_s4 + $0x58] sm:$0xff]  }
  0x95   :  { %1549 = vmatprep.subr.bf16.mxu1 %v4933_v29  ;;  %v5026_v29 = vld [vmem:[%s7039_s4 + $0xe8] sm:$0xff]   ;;  %v5015_v30 = vld [vmem:[%s7039_s4 + $0x18] sm:$0xff]  }
  0x97   :  { %1511 = vmatpush1.bf16.msra.mxu0 %v4934_v32  ;;  %v5017_v32 = vld [vmem:[%s7039_s4 + $0x10] sm:$0xff]  }
  0x98   :  { %1550 = vmatpush1.bf16.msra.mxu1 %v4931_v31  ;;  %1512 = vmatprep.subr.bf16.mxu0 %v4942_v34  ;;  %v5016_v31 = vld [vmem:[%s7039_s4 + $0x50] sm:$0xff]   ;;  %v5019_v34 = vld [vmem:[%s7039_s4 + $0x8] sm:$0xff]  }
  0x99   :  { %1551 = vmatprep.subr.bf16.mxu1 %v4939_v33  ;;  %v5018_v33 = vld [vmem:[%s7039_s4 + $0x48] sm:$0xff]  }
  0x9b   :  { %1513 = vmatpush1.bf16.msra.mxu0 %v4940_v36  ;;  %v5021_v36 = vld [vmem:[%s7039_s4] sm:$0xff]  }
  0x9c   :  { %1552 = vmatpush1.bf16.msra.mxu1 %v4937_v35  ;;  %1514 = vmatprep.subr.bf16.mxu0 %v4948_v38  ;;  %v5020_v35 = vld [vmem:[%s7039_s4 + $0x40] sm:$0xff]  }
  0x9d   :  { %1553 = vmatprep.subr.bf16.mxu1 %v4945_v37  ;;  %v5027_v37 = vld [vmem:[%s7039_s4 + $0xa8] sm:$0xff]   ;;  %v5028_v38 = vld [vmem:[%s7039_s4 + $0xe0] sm:$0xff]  }
  0x9f   :  { %1515 = vmatpush1.bf16.msra.mxu0 %v4946_v40  ;;  %v5030_v40 = vld [vmem:[%s7039_s4 + $0xd8] sm:$0xff]  }
  0xa0   :  { %1554 = vmatpush1.bf16.msra.mxu1 %v4943_v39  ;;  %1516 = vmatprep.subr.bf16.mxu0 %v4954_v42  ;;  %v5029_v39 = vld [vmem:[%s7039_s4 + $0xa0] sm:$0xff]   ;;  %v5032_v42 = vld [vmem:[%s7039_s4 + $0xd0] sm:$0xff]  }
  0xa1   :  { %1555 = vmatprep.subr.bf16.mxu1 %v4951_v41  ;;  %v5031_v41 = vld [vmem:[%s7039_s4 + $0x98] sm:$0xff]  }
  0xa3   :  { %1517 = vmatpush2.bf16.msra.mxu0 %v4952_v44  ;;  %v5034_v44 = vld [vmem:[%s7039_s4 + $0xc8] sm:$0xff]  }
  0xa4   :  { %1556 = vmatpush1.bf16.msra.mxu1 %v4949_v43  ;;  %1518 = vmatprep.subr.bf16.mxu0 %v4960_v46  ;;  %v5033_v43 = vld [vmem:[%s7039_s4 + $0x90] sm:$0xff]   ;;  %v5036_v46 = vld [vmem:[%s7039_s4 + $0xc0] sm:$0xff]  }
  0xa5   :  { %1557 = vmatprep.subr.bf16.mxu1 %v4957_v45  ;;  %v5035_v45 = vld [vmem:[%s7039_s4 + $0x88] sm:$0xff]  }
  0xa7   :  { %1519 = vmatpush2.bf16.msra.mxu0 %v4958_v48 }
  0xa8   :  { %1558 = vmatpush1.bf16.msra.mxu1 %v4955_v47  ;;  %1520 = vmatprep.subr.bf16.mxu0 %v4966_v50  ;;  %v5037_v47 = vld [vmem:[%s7039_s4 + $0x80] sm:$0xff]  }
  0xa9   :  { %1559 = vmatprep.subr.bf16.mxu1 %v4963_v49  ;;  %v246_v49 = vlaneseq }
  0xab   :  { %1521 = vmatpush2.bf16.msra.mxu0 %v4964_v53 }
  0xac   :  { %1560 = vmatpush2.bf16.msra.mxu1 %v4961_v52  ;;  %1522 = vmatprep.subr.bf16.mxu0 %v4972_v55  ;;  %v6229_v52 = vshrl.u32 %v246_v49, 7 }
  0xad   :  { %1561 = vmatprep.subr.bf16.mxu1 %v4969_v54 }
  0xae   :  { %v6232_v55 = vsub.s32 1, %v6229_v52 }
  0xaf   :  { %1523 = vmatpush2.bf16.msra.mxu0 %v4970_v57 }
  0xb0   :  { %1562 = vmatpush2.bf16.msra.mxu1 %v4967_v56  ;;  %1524 = vmatprep.subr.bf16.mxu0 %v4978_v59  ;;  %v6235_v56 = vsub.s32 0, %v6229_v52 }
  0xb1   :  { %1563 = vmatprep.subr.bf16.mxu1 %v4975_v58  ;;  %v244_v58 = vld [vmem:[%s7040_s3] sm:$0xf] }
  0xb3   :  { %1525 = vmatpush2.bf16.msra.mxu0 %v4976_v61  ;;  %v249_v61 = vrot.slane %v244_v58, %v6235_v56 }
  0xb4   :  { %1564 = vmatpush2.bf16.msra.mxu1 %v4973_v60  ;;  %1526 = vmatprep.subr.bf16.mxu0 %v4984_v63  ;;  %v253_v60 = vrot.slane %v244_v58, %v6232_v55 }
  0xb5   :  { %1565 = vmatprep.subr.bf16.mxu1 %v4981_v62 }
  0xb7   :  { %1527 = vmatpush2.bf16.msra.mxu0 %v4982_v1 }
  0xb8   :  { %1566 = vmatpush2.bf16.msra.mxu1 %v4979_v0  ;;  %1528 = vmatprep.subr.bf16.mxu0 %v4990_v3 }
  0xb9   :  { %1567 = vmatprep.subr.bf16.mxu1 %v4987_v2 }
  0xbb   :  { %1529 = vmatpush2.bf16.msra.mxu0 %v4988_v7 }
  0xbc   :  { %1568 = vmatpush2.bf16.msra.mxu1 %v4985_v6  ;;  %1530 = vmatprep.subr.bf16.mxu0 %v4996_v9 }
  0xbd   :  { %1569 = vmatprep.subr.bf16.mxu1 %v4993_v8 }
  0xbf   :  { %1531 = vmatpush2.bf16.msra.mxu0 %v4994_v13 }
  0xc0   :  { %1570 = vmatpush2.bf16.msra.mxu1 %v4991_v12  ;;  %1600 = vmatprep.subr.bf16.mxu0 %v5002_v16 }
  0xc1   :  { %1571 = vmatprep.subr.bf16.mxu1 %v4999_v15 }
  0xc2   :  { %1533 = vmatmul.mubr.bf16.vlgmr.msra.gmra.mxu0 %v5710_v5  ;;  %v5009_v5 = vld [vmem:[%s7039_s4 + $0x30] sm:$0xff]  }
  0xc3   :  { %1601 = vmatpush1.bf16.msra.mxu0 %v5000_v18  ;;  %1618 = vmatprep.mubr.bf16.mxu0 %v5430_v11 }
  0xc4   :  { %1572 = vmatpush2.bf16.msra.mxu1 %v4997_v17  ;;  %4612 = vmatprep.subr.bf16.mxu0 %v5006_v20 }
  0xc5   :  { %1573 = vmatprep.subr.bf16.mxu1 %v5005_v19 }
  0xc8   :  { %1574 = vmatpush2.bf16.msra.mxu1 %v5003_v21 }
  0xca   :  { %4314 = vmatmul.mubr.msk.bf16.vlgmr.msra.gmra.mxu0 %vm1281_vm0, %v5739_v14  ;;  %v5012_v14 = vld [vmem:[%s7039_s4 + $0x60] sm:$0xff]  }
  0xcb   :  { %1576 = vmatmul.mubr.bf16.vlgmr.msra.gmra.mxu1 %v5918_v10  ;;  %4613 = vmatpush3.bf16.msra.mxu0 %v5007_v22  ;;  %v5022_v10 = vld [vmem:[%s7039_s4 + $0xf8] sm:$0xff]  }
  0xcc   :  { %4614 = vmatprep.subr.bf16.mxu0 %v5008_v23  ;;  %4634 = vmatprep.subr.bf16.mxu1 %v5022_v10 }
  0xcd   :  { %4635 = vmatpush3.bf16.msra.mxu1 %v5023_v25 }
  0xce   :  { %4636 = vmatprep.subr.bf16.mxu1 %v5024_v26 }
  0xcf   :  { %4615 = vmatpush3.bf16.msra.mxu0 %v5009_v5 }
  0xd0   :  { %4616 = vmatprep.subr.bf16.mxu0 %v5010_v51 }
  0xd1   :  { %4637 = vmatpush3.bf16.msra.mxu1 %v5025_v28 }
  0xd2   :  { %4638 = vmatprep.subr.bf16.mxu1 %v5026_v29 }
  0xd3   :  { %4617 = vmatpush3.bf16.msra.mxu0 %v5011_v24 }
  0xd4   :  { %4618 = vmatprep.subr.bf16.mxu0 %v5012_v14 }
  0xd5   :  { %4639 = vmatpush3.bf16.msra.mxu1 %v5027_v37 }
  0xd6   :  { %4640 = vmatprep.subr.bf16.mxu1 %v5028_v38 }
  0xd7   :  { %4619 = vmatpush3.bf16.msra.mxu0 %v5013_v4 }
  0xd8   :  { %4620 = vmatprep.subr.bf16.mxu0 %v5014_v27 }
  0xd9   :  { %4641 = vmatpush3.bf16.msra.mxu1 %v5029_v39 }
  0xda   :  { %4642 = vmatprep.subr.bf16.mxu1 %v5030_v40 }
  0xdb   :  { %4621 = vmatpush3.bf16.msra.mxu0 %v5015_v30 }
  0xdc   :  { %4622 = vmatprep.subr.bf16.mxu0 %v5016_v31 }
  0xdd   :  { %4643 = vmatpush3.bf16.msra.mxu1 %v5031_v41 }
  0xde   :  { %4644 = vmatprep.subr.bf16.mxu1 %v5032_v42 }
  0xdf   :  { %4623 = vmatpush3.bf16.msra.mxu0 %v5017_v32  ;;  %v6244_v32 = vsub.s32 3, %v6229_v52 }
  0xe0   :  { %4624 = vmatprep.subr.bf16.mxu0 %v5018_v33  ;;  %v6247_v33 = vsub.s32 2, %v6229_v52 }
  0xe1   :  { %4645 = vmatpush3.bf16.msra.mxu1 %v5033_v43  ;;  %v261_v37 = vrot.slane %v244_v58, %v6244_v32 }
  0xe2   :  { %4646 = vmatprep.subr.bf16.mxu1 %v5034_v44  ;;  %v257_v38 = vrot.slane %v244_v58, %v6247_v33 }
  0xe3   :  { %4625 = vmatpush3.bf16.msra.mxu0 %v5019_v34 }
  0xe4   :  { %4626 = vmatprep.subr.bf16.mxu0 %v5020_v35 }
  0xe5   :  { %4647 = vmatpush3.bf16.msra.mxu1 %v5035_v45 }
  0xe6   :  { %4648 = vmatprep.subr.bf16.mxu1 %v5036_v46 }
  0xe7   :  { %4627 = vmatpush3.bf16.msra.mxu0 %v5021_v36 }
  0xe9   :  { %4649 = vmatpush3.bf16.msra.mxu1 %v5037_v47 }
 0x102   :  { %v1319_v53 = vpop.f32.mrf.mxu0 }
 0x103   :  { %v1362_v48 = vpop.f32.mrf.mxu1  ;;  %v1320_v1 = vadd.f32 %v1319_v53, %v249_v61 }
 0x104   :  { %v1321_v57 = vpop.f32.mrf.mxu0 }
 0x105   :  { %v1364_v50 = vpop.f32.mrf.mxu1  ;;  %v1322_v0 = vadd.f32 %v1321_v57, %v253_v60  ;;  %v1363_v12 = vadd.f32 %v1362_v48, %v1320_v1 }
 0x106   :  { %v1323_v62 = vpop.f32.mrf.mxu0 }
 0x107   :  { %v1366_v54 = vpop.f32.mrf.mxu1  ;;  %v1324_v3 = vadd.f32 %v1323_v62, %v249_v61  ;;  %v1365_v8 = vadd.f32 %v1364_v50, %v1322_v0 }
 0x108   :  { %v1325_v2 = vpop.f32.mrf.mxu0 }
 0x109   :  { %v1368_v59 = vpop.f32.mrf.mxu1  ;;  %v1326_v9 = vadd.f32 %v1325_v2, %v253_v60  ;;  %v1367_v15 = vadd.f32 %v1366_v54, %v1324_v3 }
 0x10b   :  { %v1448_v63 = vpop.f32.mrf.mxu1  ;;  %v1369_v20 = vadd.f32 %v1368_v59, %v1326_v9 }
 0x10d   :  { %v1450_v6 = vpop.f32.mrf.mxu1 }
 0x10f   :  { %v1452_v17 = vpop.f32.mrf.mxu1 }
 0x111   :  { %v1454_v24 = vpop.f32.mrf.mxu1 }
 0x142   :  { %v1405_v7 = vpop.f32.mrf.mxu0 }
 0x143   :  { %v1406_v18 = vadd.f32 %v1405_v7, %v1363_v12 }
 0x144   :  { %v1407_v13 = vpop.f32.mrf.mxu0 }
 0x145   :  { %v1408_v16 = vadd.f32 %v1407_v13, %v1365_v8  ;;  %v1449_v14 = vadd.f32 %v1448_v63, %v1406_v18 }
 0x146   :  { %v1409_v19 = vpop.f32.mrf.mxu0 }
 0x147   :  { %v1410_v21 = vadd.f32 %v1409_v19, %v1367_v15  ;;  %v1451_v23 = vadd.f32 %v1450_v6, %v1408_v16  ;;  %v1629_v27 = vmax.f32 %v1449_v14, 0.0 }
 0x148   :  { %v1411_v22 = vpop.f32.mrf.mxu0 }
 0x149   :  { %v1453_v5 = vadd.f32 %v1452_v17, %v1410_v21  ;;  %v1412_v51 = vadd.f32 %v1411_v22, %v1369_v20  ;;  %v1630_v26 = vmax.f32 %v1451_v23, 0.0  ;;  %v4315_v21 = vld [vmem:[%s7041_s5] ss:$0 sm:$0xff] }
 0x14b   :  { %v1455_v10 = vadd.f32 %v1454_v24, %v1412_v51  ;;  %v1633_v25 = vmax.f32 %v1453_v5, 0.0  ;;  %v1491_v30 = vpop.f32.mrf.mxu1 }
 0x14c   :  { %v1492_v43 = vadd.f32 %v1491_v30, %v257_v38 }
 0x14d   :  { %v1634_v4 = vmax.f32 %v1455_v10, 0.0  ;;  %v1637_v29 = vpack.c.bf16 %v1633_v25, %v1629_v27  ;;  %v1493_v31 = vpop.f32.mrf.mxu1 }
 0x14e   :  { %v1494_v42 = vadd.f32 %v1493_v31, %v261_v37  ;;  %v5040_v31 = vld [vmem:[%s7043_s6 + $0x24] ss:$16 sps:$4 sm:$0xff]  }
 0x14f   :  { %v1638_v28 = vpack.c.bf16 %v1634_v4, %v1630_v26  ;;  %v1495_v35 = vpop.f32.mrf.mxu1  ;;  %2091 = vmatprep.subr.bf16.mxu0 %v5040_v31  ;;  %v5107_v31 = vld [vmem:[%s7044_s8 + $0x690] ss:$28 sps:$4 sm:$0xff]  }
 0x150   :  { %v1496_v46 = vadd.f32 %v1495_v35, %v257_v38  ;;  %v5038_v35 = vld [vmem:[%s7043_s6 + $0x20] ss:$16 sps:$4 sm:$0xff]   ;;  %v5046_v38 = vld [vmem:[%s7043_s6 + $0x4] ss:$16 sps:$4 sm:$0xff]  }
 0x151   :  { %1936 = vmatprep.mubr.bf16.mxu0 %v1638_v28  ;;  %v1497_v40 = vpop.f32.mrf.mxu1 }
 0x152   :  { %1937 = vmatmul.mubr.bf16.vlgmr.msra.gmra.mxu0 %v1637_v29  ;;  %v1498_v53 = vadd.f32 %v1497_v40, %v261_v37  ;;  %v5043_v37 = vld [vmem:[%s7043_s6 + $0x2c] ss:$16 sps:$4 sm:$0xff]   ;;  %v5044_v40 = vld [vmem:[%s7043_s6] ss:$16 sps:$4 sm:$0xff]  }
 0x153   :  { %2111 = vmatprep.mubr.bf16.mxu0 %v5430_v11  ;;  %2092 = vmatpush1.bf16.msra.mxu0 %v5038_v35  ;;  %v5115_v35 = vld [vmem:[%s7044_s8 + $0x65c] ss:$28 sps:$4 sm:$0xff]  }
 0x154   :  { %2134 = vmatprep.subr.bf16.mxu1 %v5043_v37  ;;  %2093 = vmatprep.subr.bf16.mxu0 %v5046_v38  ;;  %v5113_v37 = vld [vmem:[%s7044_s8 + $0x658] ss:$28 sps:$4 sm:$0xff]   ;;  %v5118_v38 = vld [vmem:[%s7044_s8 + $0x2a4] ss:$28 sps:$4 sm:$0xff]  }
 0x157   :  { %2094 = vmatpush1.bf16.msra.mxu0 %v5044_v40  ;;  %v5116_v40 = vld [vmem:[%s7044_s8 + $0x2a0] ss:$28 sps:$4 sm:$0xff]  }
 0x182   :  { %v1534_v34 = vpop.f32.mrf.mxu0 }
 0x183   :  { %v1535_v48 = vadd.f32 %v1534_v34, %v1492_v43  ;;  %v5052_v43 = vld [vmem:[%s7044_s8 + $0x18c] ss:$28 sps:$4 sm:$0xff]  }
 0x184   :  { %v1536_v36 = vpop.f32.mrf.mxu0  ;;  %3622 = vmatprep.subr.bf16.mxu0 %v5052_v43  ;;  %v5127_v43 = vld [vmem:[%s7044_s8 + $0x5ec] ss:$28 sps:$4 sm:$0xff]  }
 0x185   :  { %v1537_v47 = vadd.f32 %v1536_v36, %v1494_v42  ;;  %v5041_v36 = vld [vmem:[%s7043_s6 + $0x28] ss:$16 sps:$4 sm:$0xff]  }
 0x186   :  { %v1538_v39 = vpop.f32.mrf.mxu0 }
 0x187   :  { %v1539_v54 = vadd.f32 %v1538_v39, %v1496_v46  ;;  %v5049_v39 = vld [vmem:[%s7043_s6 + $0xc] ss:$16 sps:$4 sm:$0xff]   ;;  %v46_v46 = vld [vmem:[%s7045_s1] sm:$0xff] }
 0x188   :  { %v1540_v41 = vpop.f32.mrf.mxu0 }
 0x189   :  { %v1541_v62 = vadd.f32 %v1540_v41, %v1498_v53  ;;  %v5047_v41 = vld [vmem:[%s7043_s6 + $0x8] ss:$16 sps:$4 sm:$0xff]  }
 0x18a   :  { %v1620_v45 = vpop.f32.mrf.mxu0 }
 0x18b   :  { %v1577_v44 = vpop.f32.mrf.mxu1 }
 0x18c   :  { %v1622_v50 = vpop.f32.mrf.mxu0  ;;  %v1578_v59 = vadd.f32 %v1577_v44, %v1535_v48  ;;  %v5055_v44 = vld [vmem:[%s7044_s8 + $0x50c] ss:$28 sps:$4 sm:$0xff]  }
 0x18d   :  { %v1579_v49 = vpop.f32.mrf.mxu1  ;;  %v47_v48 = vld [vmem:[%s7045_s1 + $0x8] sm:$0xff] }
 0x18e   :  { %v1580_v57 = vadd.f32 %v1579_v49, %v1537_v47  ;;  %v1624_v61 = vpop.f32.mrf.mxu0  ;;  %v1621_v6 = vadd.f32 %v1620_v45, %v1578_v59  ;;  %v5050_v59 = vld [vmem:[%s7044_s8 + $0x188] ss:$28 sps:$4 sm:$0xff]  }
 0x18f   :  { %v1581_v60 = vpop.f32.mrf.mxu1 }
 0x190   :  { %v1582_v58 = vadd.f32 %v1581_v60, %v1539_v54  ;;  %v1626_v0 = vpop.f32.mrf.mxu0  ;;  %v1623_v1 = vadd.f32 %v1622_v50, %v1580_v57  ;;  %v1631_v13 = vmax.f32 %v1621_v6, 0.0  ;;  %v5053_v60 = vld [vmem:[%s7044_s8 + $0x508] ss:$28 sps:$4 sm:$0xff]   ;;  %v5065_v6 = vld [vmem:[%s7044_s8 + $0x498] ss:$28 sps:$4 sm:$0xff]  }
 0x191   :  { %v1583_v63 = vpop.f32.mrf.mxu1 }
 0x192   :  { %v1625_v2 = vadd.f32 %v1624_v61, %v1582_v58  ;;  %v1584_v3 = vadd.f32 %v1583_v63, %v1541_v62  ;;  %v1632_v9 = vmax.f32 %v1623_v1, 0.0  ;;  %v5058_v62 = vld [vmem:[%s7044_s8 + $0x154] ss:$28 sps:$4 sm:$0xff]   ;;  %v5064_v1 = vld [vmem:[%s7044_s8 + $0x11c] ss:$28 sps:$4 sm:$0xff]  }
 0x193   :  { %v5061_v58 = vld [vmem:[%s7044_s8 + $0x4d4] ss:$28 sps:$4 sm:$0xff]  }
 0x194   :  { %v1627_v7 = vadd.f32 %v1626_v0, %v1584_v3  ;;  %v1635_v8 = vmax.f32 %v1625_v2, 0.0  ;;  %v5056_v63 = vld [vmem:[%s7044_s8 + $0x150] ss:$28 sps:$4 sm:$0xff]   ;;  %v5067_v2 = vld [vmem:[%s7044_s8 + $0x49c] ss:$28 sps:$4 sm:$0xff]  }
 0x195   :  { %v5059_v0 = vld [vmem:[%s7044_s8 + $0x4d0] ss:$28 sps:$4 sm:$0xff]   ;;  %v5062_v3 = vld [vmem:[%s7044_s8 + $0x118] ss:$28 sps:$4 sm:$0xff]  }
 0x196   :  { %v1636_v12 = vmax.f32 %v1627_v7, 0.0  ;;  %v1639_v16 = vpack.c.bf16 %v1635_v8, %v1631_v13  ;;  %v5070_v7 = vld [vmem:[%s7044_s8 + $0xe4] ss:$28 sps:$4 sm:$0xff]   ;;  %v5076_v13 = vld [vmem:[%s7044_s8 + $0xac] ss:$28 sps:$4 sm:$0xff]  }
 0x197   :  { %v5073_v8 = vld [vmem:[%s7044_s8 + $0x464] ss:$28 sps:$4 sm:$0xff]  }
 0x198   :  { %v1640_v15 = vpack.c.bf16 %v1636_v12, %v1632_v9  ;;  %v5068_v9 = vld [vmem:[%s7044_s8 + $0xe0] ss:$28 sps:$4 sm:$0xff]  }
 0x199   :  { %v5071_v12 = vld [vmem:[%s7044_s8 + $0x460] ss:$28 sps:$4 sm:$0xff]  }
 0x19a   :  { %1977 = vmatprep.mubr.bf16.mxu1 %v1640_v15  ;;  %v5079_v15 = vld [vmem:[%s7044_s8 + $0x42c] ss:$28 sps:$4 sm:$0xff]  }
 0x19b   :  { %1978 = vmatmul.mubr.bf16.vlgmr.msra.gmra.mxu1 %v1639_v16  ;;  %v5074_v16 = vld [vmem:[%s7044_s8 + $0xa8] ss:$28 sps:$4 sm:$0xff]  }
 0x19c   :  { %2154 = vmatprep.mubr.bf16.mxu1 %v5430_v11  ;;  %2135 = vmatpush1.bf16.msra.mxu1 %v5041_v36  ;;  %v5110_v36 = vld [vmem:[%s7044_s8 + $0x2d8] ss:$28 sps:$4 sm:$0xff]  }
 0x19d   :  { %2136 = vmatprep.subr.bf16.mxu1 %v5049_v39  ;;  %v5121_v39 = vld [vmem:[%s7044_s8 + $0x624] ss:$28 sps:$4 sm:$0xff]  }
 0x1a0   :  { %2137 = vmatpush1.bf16.msra.mxu1 %v5047_v41  ;;  %v5119_v41 = vld [vmem:[%s7044_s8 + $0x620] ss:$28 sps:$4 sm:$0xff]  }
 0x1a1   :  { %3665 = vmatprep.subr.bf16.mxu1 %v5055_v44  ;;  %v5122_v44 = vld [vmem:[%s7044_s8 + $0x268] ss:$28 sps:$4 sm:$0xff]  }
 0x212   :  { %v4628_v17 = vpop.f32.mrf.mxu0 }
 0x214   :  { %v4629_v18 = vpop.f32.mrf.mxu0 }
 0x215   :  { %v4630_v20 = vadd.f32 %v4629_v18, %v4628_v17  ;;  %v5077_v17 = vld [vmem:[%s7044_s8 + $0x428] ss:$28 sps:$4 sm:$0xff]   ;;  %v5082_v18 = vld [vmem:[%s7044_s8 + $0x74] ss:$28 sps:$4 sm:$0xff]  }
 0x216   :  { %v4631_v19 = vpop.f32.mrf.mxu0 }
 0x217   :  { %v1939_v51 = vadd.f32 %v4630_v20, %v4315_v21  ;;  %v5080_v20 = vld [vmem:[%s7044_s8 + $0x70] ss:$28 sps:$4 sm:$0xff]  }
 0x218   :  { %v4632_v22 = vpop.f32.mrf.mxu0 }
 0x219   :  { %v4633_v24 = vadd.f32 %v4632_v22, %v4631_v19  ;;  %v5085_v19 = vld [vmem:[%s7044_s8 + $0x3f4] ss:$28 sps:$4 sm:$0xff]   ;;  %v5088_v22 = vld [vmem:[%s7044_s8 + $0x3c] ss:$28 sps:$4 sm:$0xff]  }
 0x21b   :  { %v1942_v4 = vadd.f32 %v4633_v24, %v4315_v21  ;;  %v5083_v21 = vld [vmem:[%s7044_s8 + $0x3f0] ss:$28 sps:$4 sm:$0xff]   ;;  %v5094_v24 = vld [vmem:[%s7044_s8 + $0x4] ss:$28 sps:$4 sm:$0xff]  }
 0x25b   :  { %v4650_v23 = vpop.f32.mrf.mxu1 }
 0x25d   :  { %v4651_v5 = vpop.f32.mrf.mxu1 }
 0x25e   :  { %v4652_v14 = vadd.f32 %v4651_v5, %v4650_v23  ;;  %v5091_v23 = vld [vmem:[%s7044_s8 + $0x3bc] ss:$28 sps:$4 sm:$0xff]  }
 0x25f   :  { %v4653_v10 = vpop.f32.mrf.mxu1  ;;  %v5086_v5 = vld [vmem:[%s7044_s8 + $0x38] ss:$28 sps:$4 sm:$0xff]  }
 0x260   :  { %v1980_v25 = vadd.f32 %v4652_v14, %v1939_v51  ;;  %v5089_v51 = vld [vmem:[%s7044_s8 + $0x3b8] ss:$28 sps:$4 sm:$0xff]   ;;  %v5097_v14 = vld [vmem:[%s7044_s8 + $0x384] ss:$28 sps:$4 sm:$0xff]  }
 0x261   :  { %v4654_v26 = vpop.f32.mrf.mxu1 }
 0x262   :  { %v1986_v11 = vmul.f32 0.5, %v1980_v25  ;;  %4100 = vst.msk [vmem:[%s7042_s11] sm:$0xff] %vm4099_vm1, %v1980_v25  ;;  %v4655_v27 = vadd.f32 %v4654_v26, %v4653_v10  ;;  %v5092_v10 = vld [vmem:[%s7044_s8] ss:$28 sps:$4 sm:$0xff]   ;;  %v5100_v26 = vld [vmem:[%s7044_s8 + $0x34c] ss:$28 sps:$4 sm:$0xff]  }
 0x264   :  { %v1988_v28 = vmul.f32 1.442695, %v1986_v11  ;;  %v1983_v29 = vadd.f32 %v4655_v27, %v1942_v4  ;;  %v5103_v4 = vld [vmem:[%s7044_s8 + $0x6cc] ss:$28 sps:$4 sm:$0xff]  }
 0x265   :  { %v5098_v11 = vld [vmem:[%s7044_s8 + $0x348] ss:$28 sps:$4 sm:$0xff]  }
 0x266   :  { %5370 = vpow2.f32 %v1988_v28  ;;  %v1987_v30 = vmul.f32 0.5, %v1983_v29  ;;  %4101 = vst.msk [vmem:[%s7042_s11 + $0x8] sm:$0xff] %vm4099_vm1, %v1983_v29  ;;  %v5101_v27 = vld [vmem:[%s7044_s8 + $0x6c8] ss:$28 sps:$4 sm:$0xff]   ;;  %v5106_v28 = vld [vmem:[%s7044_s8 + $0x314] ss:$28 sps:$4 sm:$0xff]  }
 0x268   :  { %v1990_v34 = vmul.f32 1.442695, %v1987_v30  ;;  %v5104_v30 = vld [vmem:[%s7044_s8 + $0x310] ss:$28 sps:$4 sm:$0xff]  }
 0x26a   :  { %5372 = vpow2.f32 %v1990_v34  ;;  %v5112_v34 = vld [vmem:[%s7044_s8 + $0x2dc] ss:$28 sps:$4 sm:$0xff]  }
 0x273   :  { %v5371_v42 = vpop.eup %5370 }
 0x274   :  { %1994 = vrot.lane.b32.xlu0 %v5371_v42, %s5431_s19  ;;  %v5124_v42 = vld [vmem:[%s7044_s8 + $0x26c] ss:$28 sps:$4 sm:$0xff]  }
 0x277   :  { %v5373_v45 = vpop.eup %5372 }
 0x278   :  { %1996 = vrot.lane.b32.xlu0 %v5373_v45, %s5431_s19  ;;  %v5125_v45 = vld [vmem:[%s7044_s8 + $0x5e8] ss:$28 sps:$4 sm:$0xff]  }
 0x2e6   :  { %v1995_v47 = vpop.permute.xlu0 %1994 }
 0x2e7   :  { %v2000_v49 = vmul.f32 %v1995_v47, %v46_v46  ;;  %v5130_v46 = vld [vmem:[%s7044_s8 + $0x234] ss:$28 sps:$4 sm:$0xff]  }
 0x2e8   :  { %v5133_v47 = vld [vmem:[%s7044_s8 + $0x5b4] ss:$28 sps:$4 sm:$0xff]  }
 0x2e9   :  { %v2002_v54 = vadd.f32 %v2000_v49, %v1980_v25  ;;  %v5095_v25 = vld [vmem:[%s7044_s8 + $0x380] ss:$28 sps:$4 sm:$0xff]   ;;  %v5131_v49 = vld [vmem:[%s7044_s8 + $0x5b0] ss:$28 sps:$4 sm:$0xff]  }
 0x2ea   :  { %v1997_v50 = vpop.permute.xlu0 %1996 }
 0x2eb   :  { %v2001_v53 = vmul.f32 %v1997_v50, %v47_v48  ;;  %v5128_v48 = vld [vmem:[%s7044_s8 + $0x230] ss:$28 sps:$4 sm:$0xff]   ;;  %v5136_v50 = vld [vmem:[%s7044_s8 + $0x1fc] ss:$28 sps:$4 sm:$0xff]  }
 0x2ed   :  { %v2003_v57 = vadd.f32 %v2001_v53, %v1983_v29  ;;  %v5109_v29 = vld [vmem:[%s7044_s8 + $0x694] ss:$28 sps:$4 sm:$0xff]   ;;  %v5139_v53 = vld [vmem:[%s7044_s8 + $0x57c] ss:$28 sps:$4 sm:$0xff]  }
 0x2ef   :  { %v2004_v61 = vpack.c.bf16 %v2003_v57, %v2002_v54  ;;  %v5134_v54 = vld [vmem:[%s7044_s8 + $0x1f8] ss:$28 sps:$4 sm:$0xff]  }
 0x2f0   :  { %v5137_v57 = vld [vmem:[%s7044_s8 + $0x578] ss:$28 sps:$4 sm:$0xff]  }
 0x2f1   :  { %4356 = vmatmul.mubr.msk.bf16.vlgmr.msra.gmra.mxu0 %vm2075_vm2, %v2004_v61  ;;  %4357 = vmatmul.mubr.msk.bf16.vlgmr.msra.gmra.mxu1 %vm2075_vm2, %v2004_v61  ;;  %v5140_v61 = vld [vmem:[%s7044_s8 + $0x1c0] ss:$28 sps:$4 sm:$0xff]  }
 0x2f2   :  { %3623 = vmatpush1.bf16.msra.mxu0 %v5050_v59  ;;  %3666 = vmatpush1.bf16.msra.mxu1 %v5053_v60  ;;  %v5142_v59 = vld [vmem:[%s7044_s8 + $0x1c4] ss:$28 sps:$4 sm:$0xff]  }
 0x2f3   :  { %3624 = vmatprep.subr.bf16.mxu0 %v5058_v62  ;;  %3667 = vmatprep.subr.bf16.mxu1 %v5061_v58  ;;  %v5145_v60 = vld [vmem:[%s7044_s8 + $0x544] ss:$28 sps:$4 sm:$0xff]   ;;  %v5148_v58 = vld [vmem:[%s7044_s8 + $0x194] ss:$28 sps:$4 sm:$0xff]  }
 0x2f4   :  { %v5143_v62 = vld [vmem:[%s7044_s8 + $0x540] ss:$28 sps:$4 sm:$0xff]  }
 0x2f6   :  { %3625 = vmatpush1.bf16.msra.mxu0 %v5056_v63  ;;  %3668 = vmatpush1.bf16.msra.mxu1 %v5059_v0  ;;  %v5151_v63 = vld [vmem:[%s7044_s8 + $0x514] ss:$28 sps:$4 sm:$0xff]   ;;  %v2013_v0 = vld [vmem:[%s7046_s7] sm:$0xf] }
 0x2f7   :  { %3626 = vmatprep.subr.bf16.mxu0 %v5064_v1  ;;  %3669 = vmatprep.subr.bf16.mxu1 %v5067_v2 }
 0x2fa   :  { %3627 = vmatpush1.bf16.msra.mxu0 %v5062_v3  ;;  %3670 = vmatpush1.bf16.msra.mxu1 %v5065_v6  ;;  %v2022_v3 = vrot.slane %v2013_v0, %v6232_v55  ;;  %v2030_v6 = vrot.slane %v2013_v0, %v6244_v32 }
 0x2fb   :  { %3628 = vmatprep.subr.bf16.mxu0 %v5070_v7  ;;  %3671 = vmatprep.subr.bf16.mxu1 %v5073_v8  ;;  %v2018_v7 = vrot.slane %v2013_v0, %v6235_v56  ;;  %v2026_v8 = vrot.slane %v2013_v0, %v6247_v33  ;;  %v5190_v0 = vld [vmem:[%s7044_s8 + $0xc] ss:$28 sps:$4 sm:$0xff]  }
 0x2fe   :  { %3629 = vmatpush1.bf16.msra.mxu0 %v5068_v9  ;;  %3672 = vmatpush1.bf16.msra.mxu1 %v5071_v12 }
 0x2ff   :  { %3630 = vmatprep.subr.bf16.mxu0 %v5076_v13  ;;  %3673 = vmatprep.subr.bf16.mxu1 %v5079_v15 }
 0x302   :  { %3631 = vmatpush1.bf16.msra.mxu0 %v5074_v16  ;;  %3674 = vmatpush1.bf16.msra.mxu1 %v5077_v17 }
 0x303   :  { %3632 = vmatprep.subr.bf16.mxu0 %v5082_v18  ;;  %3675 = vmatprep.subr.bf16.mxu1 %v5085_v19 }
 0x306   :  { %3633 = vmatpush1.bf16.msra.mxu0 %v5080_v20  ;;  %3676 = vmatpush1.bf16.msra.mxu1 %v5083_v21 }
 0x307   :  { %3634 = vmatprep.subr.bf16.mxu0 %v5088_v22  ;;  %3677 = vmatprep.subr.bf16.mxu1 %v5091_v23 }
 0x30a   :  { %3635 = vmatpush1.bf16.msra.mxu0 %v5086_v5  ;;  %3678 = vmatpush1.bf16.msra.mxu1 %v5089_v51 }
 0x30b   :  { %3636 = vmatprep.subr.bf16.mxu0 %v5094_v24  ;;  %3679 = vmatprep.subr.bf16.mxu1 %v5097_v14 }
 0x30e   :  { %3637 = vmatpush1.bf16.msra.mxu0 %v5092_v10  ;;  %3680 = vmatpush1.bf16.msra.mxu1 %v5095_v25 }
 0x30f   :  { %3638 = vmatprep.subr.bf16.mxu0 %v5100_v26  ;;  %3681 = vmatprep.subr.bf16.mxu1 %v5103_v4 }
 0x312   :  { %3639 = vmatpush2.bf16.msra.mxu0 %v5098_v11  ;;  %3682 = vmatpush2.bf16.msra.mxu1 %v5101_v27 }
 0x313   :  { %3640 = vmatprep.subr.bf16.mxu0 %v5106_v28  ;;  %3683 = vmatprep.subr.bf16.mxu1 %v5109_v29 }
 0x316   :  { %3641 = vmatpush2.bf16.msra.mxu0 %v5104_v30  ;;  %3684 = vmatpush2.bf16.msra.mxu1 %v5107_v31  ;;  %v5146_v30 = vld [vmem:[%s7044_s8 + $0x190] ss:$28 sps:$4 sm:$0xff]  }
 0x317   :  { %3642 = vmatprep.subr.bf16.mxu0 %v5112_v34  ;;  %3685 = vmatprep.subr.bf16.mxu1 %v5115_v35  ;;  %v5149_v31 = vld [vmem:[%s7044_s8 + $0x510] ss:$28 sps:$4 sm:$0xff]  }
 0x31a   :  { %3643 = vmatpush2.bf16.msra.mxu0 %v5110_v36  ;;  %3686 = vmatpush2.bf16.msra.mxu1 %v5113_v37  ;;  %v5154_v36 = vld [vmem:[%s7044_s8 + $0x15c] ss:$28 sps:$4 sm:$0xff]  }
 0x31b   :  { %3644 = vmatprep.subr.bf16.mxu0 %v5118_v38  ;;  %3687 = vmatprep.subr.bf16.mxu1 %v5121_v39  ;;  %v5157_v37 = vld [vmem:[%s7044_s8 + $0x4dc] ss:$28 sps:$4 sm:$0xff]  }
 0x31c   :  { %v5152_v38 = vld [vmem:[%s7044_s8 + $0x158] ss:$28 sps:$4 sm:$0xff]  }
 0x31d   :  { %v5155_v39 = vld [vmem:[%s7044_s8 + $0x4d8] ss:$28 sps:$4 sm:$0xff]  }
 0x31e   :  { %3645 = vmatpush2.bf16.msra.mxu0 %v5116_v40  ;;  %3688 = vmatpush2.bf16.msra.mxu1 %v5119_v41  ;;  %v5160_v40 = vld [vmem:[%s7044_s8 + $0x124] ss:$28 sps:$4 sm:$0xff]  }
 0x31f   :  { %3646 = vmatprep.subr.bf16.mxu0 %v5124_v42  ;;  %3689 = vmatprep.subr.bf16.mxu1 %v5127_v43  ;;  %v5163_v41 = vld [vmem:[%s7044_s8 + $0x4a4] ss:$28 sps:$4 sm:$0xff]  }
 0x320   :  { %v5158_v42 = vld [vmem:[%s7044_s8 + $0x120] ss:$28 sps:$4 sm:$0xff]  }
 0x321   :  { %v5161_v43 = vld [vmem:[%s7044_s8 + $0x4a0] ss:$28 sps:$4 sm:$0xff]  }
 0x322   :  { %3647 = vmatpush2.bf16.msra.mxu0 %v5122_v44  ;;  %3690 = vmatpush2.bf16.msra.mxu1 %v5125_v45  ;;  %v5166_v44 = vld [vmem:[%s7044_s8 + $0xec] ss:$28 sps:$4 sm:$0xff]  }
 0x323   :  { %3648 = vmatprep.subr.bf16.mxu0 %v5130_v46  ;;  %3691 = vmatprep.subr.bf16.mxu1 %v5133_v47  ;;  %v5169_v45 = vld [vmem:[%s7044_s8 + $0x46c] ss:$28 sps:$4 sm:$0xff]  }
 0x324   :  { %v5164_v46 = vld [vmem:[%s7044_s8 + $0xe8] ss:$28 sps:$4 sm:$0xff]  }
 0x325   :  { %v5167_v47 = vld [vmem:[%s7044_s8 + $0x468] ss:$28 sps:$4 sm:$0xff]  }
 0x326   :  { %3649 = vmatpush2.bf16.msra.mxu0 %v5128_v48  ;;  %3692 = vmatpush2.bf16.msra.mxu1 %v5131_v49  ;;  %v5172_v48 = vld [vmem:[%s7044_s8 + $0xb4] ss:$28 sps:$4 sm:$0xff]  }
 0x327   :  { %3650 = vmatprep.subr.bf16.mxu0 %v5136_v50  ;;  %3693 = vmatprep.subr.bf16.mxu1 %v5139_v53  ;;  %v5175_v49 = vld [vmem:[%s7044_s8 + $0x434] ss:$28 sps:$4 sm:$0xff]  }
 0x328   :  { %v5170_v50 = vld [vmem:[%s7044_s8 + $0xb0] ss:$28 sps:$4 sm:$0xff]  }
 0x329   :  { %v5173_v53 = vld [vmem:[%s7044_s8 + $0x430] ss:$28 sps:$4 sm:$0xff]  }
 0x32a   :  { %3651 = vmatpush2.bf16.msra.mxu0 %v5134_v54  ;;  %3694 = vmatpush2.bf16.msra.mxu1 %v5137_v57  ;;  %v5178_v54 = vld [vmem:[%s7044_s8 + $0x7c] ss:$28 sps:$4 sm:$0xff]  }
 0x32b   :  { %3652 = vmatprep.subr.bf16.mxu0 %v5142_v59  ;;  %3695 = vmatprep.subr.bf16.mxu1 %v5145_v60  ;;  %v5181_v57 = vld [vmem:[%s7044_s8 + $0x3fc] ss:$28 sps:$4 sm:$0xff]  }
 0x32c   :  { %v5176_v59 = vld [vmem:[%s7044_s8 + $0x78] ss:$28 sps:$4 sm:$0xff]  }
 0x32d   :  { %v5179_v60 = vld [vmem:[%s7044_s8 + $0x3f8] ss:$28 sps:$4 sm:$0xff]  }
 0x32e   :  { %3653 = vmatpush2.bf16.msra.mxu0 %v5140_v61  ;;  %3696 = vmatpush2.bf16.msra.mxu1 %v5143_v62  ;;  %v5184_v61 = vld [vmem:[%s7044_s8 + $0x44] ss:$28 sps:$4 sm:$0xff]  }
 0x32f   :  { %3708 = vmatprep.subr.bf16.mxu0 %v5148_v58  ;;  %3751 = vmatprep.subr.bf16.mxu1 %v5151_v63  ;;  %v5187_v62 = vld [vmem:[%s7044_s8 + $0x3c4] ss:$28 sps:$4 sm:$0xff]  }
 0x330   :  { %v5182_v58 = vld [vmem:[%s7044_s8 + $0x40] ss:$28 sps:$4 sm:$0xff]  }
 0x331   :  { %v5185_v63 = vld [vmem:[%s7044_s8 + $0x3c0] ss:$28 sps:$4 sm:$0xff]  }
 0x3b1   :  { %v2113_v1 = vpop.f32.mrf.mxu0  ;;  %v2156_v2 = vpop.f32.mrf.mxu1 }
 0x3b2   :  { %v2114_v20 = vadd.f32 %v2113_v1, %v2018_v7  ;;  %v2157_v21 = vadd.f32 %v2156_v2, %v2026_v8  ;;  %v5193_v1 = vld [vmem:[%s7044_s8 + $0x38c] ss:$28 sps:$4 sm:$0xff]  }
 0x3b3   :  { %v2115_v9 = vpop.f32.mrf.mxu0  ;;  %v2158_v12 = vpop.f32.mrf.mxu1  ;;  %v5188_v2 = vld [vmem:[%s7044_s8 + $0x8] ss:$28 sps:$4 sm:$0xff]  }
 0x3b4   :  { %v2116_v16 = vadd.f32 %v2115_v9, %v2022_v3  ;;  %v2159_v17 = vadd.f32 %v2158_v12, %v2030_v6  ;;  %v2165_v11 = vmax.f32 %v2114_v20, 0.0  ;;  %v2167_v27 = vmax.f32 %v2157_v21, 0.0  ;;  %v5197_v9 = vld [vmem:[%s7044_s8 + $0x6d0] ss:$28 sps:$4 sm:$0xff]   ;;  %v5202_v12 = vld [vmem:[%s7044_s8 + $0x31c] ss:$28 sps:$4 sm:$0xff]  }
 0x3b5   :  { %v2117_v13 = vpop.f32.mrf.mxu0  ;;  %v2160_v15 = vpop.f32.mrf.mxu1  ;;  %v5209_v20 = vld [vmem:[%s7044_s8 + $0x660] ss:$28 sps:$4 sm:$0xff]   ;;  %v5214_v21 = vld [vmem:[%s7044_s8 + $0x2ac] ss:$28 sps:$4 sm:$0xff]  }
 0x3b6   :  { %v2118_v18 = vadd.f32 %v2117_v13, %v2018_v7  ;;  %v2161_v19 = vadd.f32 %v2160_v15, %v2026_v8  ;;  %v2166_v10 = vmax.f32 %v2116_v16, 0.0  ;;  %v2168_v25 = vmax.f32 %v2159_v17, 0.0  ;;  %v5199_v7 = vld [vmem:[%s7044_s8 + $0x6d4] ss:$28 sps:$4 sm:$0xff]   ;;  %v5205_v13 = vld [vmem:[%s7044_s8 + $0x69c] ss:$28 sps:$4 sm:$0xff]  }
 0x3b7   :  { %v2119_v22 = vpop.f32.mrf.mxu0  ;;  %v2162_v23 = vpop.f32.mrf.mxu1  ;;  %v5194_v8 = vld [vmem:[%s7044_s8 + $0x350] ss:$28 sps:$4 sm:$0xff]   ;;  %v5200_v15 = vld [vmem:[%s7044_s8 + $0x318] ss:$28 sps:$4 sm:$0xff]   ;;  %v5208_v17 = vld [vmem:[%s7044_s8 + $0x2e4] ss:$28 sps:$4 sm:$0xff]  }
 0x3b8   :  { %v2120_v5 = vadd.f32 %v2119_v22, %v2022_v3  ;;  %v2163_v51 = vadd.f32 %v2162_v23, %v2030_v6  ;;  %v2169_v24 = vmax.f32 %v2118_v18, 0.0  ;;  %v2171_v14 = vmax.f32 %v2161_v19, 0.0  ;;  %v5191_v3 = vld [vmem:[%s7044_s8 + $0x388] ss:$28 sps:$4 sm:$0xff]   ;;  %v5196_v6 = vld [vmem:[%s7044_s8 + $0x354] ss:$28 sps:$4 sm:$0xff]  }
 0x3b9   :  { %v5203_v16 = vld [vmem:[%s7044_s8 + $0x698] ss:$28 sps:$4 sm:$0xff]   ;;  %v5211_v18 = vld [vmem:[%s7044_s8 + $0x664] ss:$28 sps:$4 sm:$0xff]   ;;  %v5217_v22 = vld [vmem:[%s7044_s8 + $0x62c] ss:$28 sps:$4 sm:$0xff]  }
 0x3ba   :  { %v2170_v26 = vmax.f32 %v2120_v5, 0.0  ;;  %v2172_v4 = vmax.f32 %v2163_v51, 0.0  ;;  %v6506_v34 = vpack.c.bf16 %v2169_v24, %v2165_v11  ;;  %v6508_v35 = vpack.c.bf16 %v2171_v14, %v2167_v27  ;;  %v5206_v19 = vld [vmem:[%s7044_s8 + $0x2e0] ss:$28 sps:$4 sm:$0xff]   ;;  %v5212_v23 = vld [vmem:[%s7044_s8 + $0x2a8] ss:$28 sps:$4 sm:$0xff]  }
 0x3bb   :  { %v5215_v5 = vld [vmem:[%s7044_s8 + $0x628] ss:$28 sps:$4 sm:$0xff]   ;;  %v5220_v51 = vld [vmem:[%s7044_s8 + $0x274] ss:$28 sps:$4 sm:$0xff]  }
 0x3bc   :  { %v6496_v28 = vpack.c.bf16 %v2170_v26, %v2166_v10  ;;  %v6498_v29 = vpack.c.bf16 %v2172_v4, %v2168_v25  ;;  %v5223_v24 = vld [vmem:[%s7044_s8 + $0x5f4] ss:$28 sps:$4 sm:$0xff]   ;;  %v5226_v25 = vld [vmem:[%s7044_s8 + $0x23c] ss:$28 sps:$4 sm:$0xff]   ;;  %v5232_v27 = vld [vmem:[%s7044_s8 + $0x204] ss:$28 sps:$4 sm:$0xff]  }
 0x3bd   :  { %v5218_v14 = vld [vmem:[%s7044_s8 + $0x270] ss:$28 sps:$4 sm:$0xff]   ;;  %v5229_v26 = vld [vmem:[%s7044_s8 + $0x5bc] ss:$28 sps:$4 sm:$0xff]  }
 0x3be   :  { %3654 = vmatprep.mubr.bf16.mxu0 %v6496_v28  ;;  %3697 = vmatprep.mubr.bf16.mxu1 %v6498_v29  ;;  %v5221_v10 = vld [vmem:[%s7044_s8 + $0x5f0] ss:$28 sps:$4 sm:$0xff]   ;;  %v5224_v4 = vld [vmem:[%s7044_s8 + $0x238] ss:$28 sps:$4 sm:$0xff]  }
 0x3bf   :  { %3655 = vmatmul.mubr.bf16.vlgmr.msra.gmra.mxu0 %v6506_v34  ;;  %3698 = vmatmul.mubr.bf16.vlgmr.msra.gmra.mxu1 %v6508_v35  ;;  %v5227_v11 = vld [vmem:[%s7044_s8 + $0x5b8] ss:$28 sps:$4 sm:$0xff]  }
 0x3c0   :  { %3709 = vmatpush1.bf16.msra.mxu0 %v5146_v30  ;;  %3752 = vmatpush1.bf16.msra.mxu1 %v5149_v31  ;;  %v5235_v30 = vld [vmem:[%s7044_s8 + $0x584] ss:$28 sps:$4 sm:$0xff]  }
 0x3c1   :  { %3740 = vmatprep.mubr.bf16.mxu0 %v6496_v28  ;;  %3783 = vmatprep.mubr.bf16.mxu1 %v6498_v29  ;;  %v5230_v31 = vld [vmem:[%s7044_s8 + $0x200] ss:$28 sps:$4 sm:$0xff]  }
 0x3c2   :  { %3710 = vmatprep.subr.bf16.mxu0 %v5154_v36  ;;  %3753 = vmatprep.subr.bf16.mxu1 %v5157_v37  ;;  %v5233_v36 = vld [vmem:[%s7044_s8 + $0x580] ss:$28 sps:$4 sm:$0xff]   ;;  %v5238_v37 = vld [vmem:[%s7044_s8 + $0x1cc] ss:$28 sps:$4 sm:$0xff]  }
 0x3c4   :  { %3711 = vmatpush1.bf16.msra.mxu0 %v5152_v38  ;;  %3754 = vmatpush1.bf16.msra.mxu1 %v5155_v39  ;;  %v5241_v38 = vld [vmem:[%s7044_s8 + $0x54c] ss:$28 sps:$4 sm:$0xff]  }
 0x3c5   :  { %3712 = vmatprep.subr.bf16.mxu0 %v5160_v40  ;;  %3755 = vmatprep.subr.bf16.mxu1 %v5163_v41  ;;  %v5236_v39 = vld [vmem:[%s7044_s8 + $0x1c8] ss:$28 sps:$4 sm:$0xff]   ;;  %v5244_v41 = vld [vmem:[%s7044_s8 + $0x19c] ss:$28 sps:$4 sm:$0xff]  }
 0x3c6   :  { %v5239_v40 = vld [vmem:[%s7044_s8 + $0x548] ss:$28 sps:$4 sm:$0xff]  }
 0x3c8   :  { %3713 = vmatpush1.bf16.msra.mxu0 %v5158_v42  ;;  %3756 = vmatpush1.bf16.msra.mxu1 %v5161_v43  ;;  %v5247_v42 = vld [vmem:[%s7044_s8 + $0x51c] ss:$28 sps:$4 sm:$0xff]  }
 0x3c9   :  { %3714 = vmatprep.subr.bf16.mxu0 %v5166_v44  ;;  %3757 = vmatprep.subr.bf16.mxu1 %v5169_v45  ;;  %v5242_v43 = vld [vmem:[%s7044_s8 + $0x198] ss:$28 sps:$4 sm:$0xff]   ;;  %v5250_v45 = vld [vmem:[%s7044_s8 + $0x164] ss:$28 sps:$4 sm:$0xff]  }
 0x3ca   :  { %v5245_v44 = vld [vmem:[%s7044_s8 + $0x518] ss:$28 sps:$4 sm:$0xff]  }
 0x3cc   :  { %3715 = vmatpush1.bf16.msra.mxu0 %v5164_v46  ;;  %3758 = vmatpush1.bf16.msra.mxu1 %v5167_v47  ;;  %v5253_v46 = vld [vmem:[%s7044_s8 + $0x4e4] ss:$28 sps:$4 sm:$0xff]  }
 0x3cd   :  { %3716 = vmatprep.subr.bf16.mxu0 %v5172_v48  ;;  %3759 = vmatprep.subr.bf16.mxu1 %v5175_v49  ;;  %v5248_v47 = vld [vmem:[%s7044_s8 + $0x160] ss:$28 sps:$4 sm:$0xff]   ;;  %v5256_v49 = vld [vmem:[%s7044_s8 + $0x12c] ss:$28 sps:$4 sm:$0xff]  }
 0x3ce   :  { %v5251_v48 = vld [vmem:[%s7044_s8 + $0x4e0] ss:$28 sps:$4 sm:$0xff]  }
 0x3d0   :  { %3717 = vmatpush1.bf16.msra.mxu0 %v5170_v50  ;;  %3760 = vmatpush1.bf16.msra.mxu1 %v5173_v53  ;;  %v5259_v50 = vld [vmem:[%s7044_s8 + $0x4ac] ss:$28 sps:$4 sm:$0xff]  }
 0x3d1   :  { %3718 = vmatprep.subr.bf16.mxu0 %v5178_v54  ;;  %3761 = vmatprep.subr.bf16.mxu1 %v5181_v57  ;;  %v5254_v53 = vld [vmem:[%s7044_s8 + $0x128] ss:$28 sps:$4 sm:$0xff]   ;;  %v5262_v57 = vld [vmem:[%s7044_s8 + $0xf4] ss:$28 sps:$4 sm:$0xff]  }
 0x3d2   :  { %v5257_v54 = vld [vmem:[%s7044_s8 + $0x4a8] ss:$28 sps:$4 sm:$0xff]  }
 0x3d4   :  { %3719 = vmatpush1.bf16.msra.mxu0 %v5176_v59  ;;  %3762 = vmatpush1.bf16.msra.mxu1 %v5179_v60  ;;  %v5265_v59 = vld [vmem:[%s7044_s8 + $0x474] ss:$28 sps:$4 sm:$0xff]  }
 0x3d5   :  { %3720 = vmatprep.subr.bf16.mxu0 %v5184_v61  ;;  %3763 = vmatprep.subr.bf16.mxu1 %v5187_v62  ;;  %v5260_v60 = vld [vmem:[%s7044_s8 + $0xf0] ss:$28 sps:$4 sm:$0xff]   ;;  %v5268_v62 = vld [vmem:[%s7044_s8 + $0xbc] ss:$28 sps:$4 sm:$0xff]  }
 0x3d6   :  { %v5263_v61 = vld [vmem:[%s7044_s8 + $0x470] ss:$28 sps:$4 sm:$0xff]  }
 0x3d8   :  { %3721 = vmatpush1.bf16.msra.mxu0 %v5182_v58  ;;  %3764 = vmatpush1.bf16.msra.mxu1 %v5185_v63  ;;  %v5271_v58 = vld [vmem:[%s7044_s8 + $0x43c] ss:$28 sps:$4 sm:$0xff]  }
 0x3d9   :  { %3722 = vmatprep.subr.bf16.mxu0 %v5190_v0  ;;  %3765 = vmatprep.subr.bf16.mxu1 %v5193_v1  ;;  %v5266_v63 = vld [vmem:[%s7044_s8 + $0xb8] ss:$28 sps:$4 sm:$0xff]   ;;  %v5274_v1 = vld [vmem:[%s7044_s8 + $0x84] ss:$28 sps:$4 sm:$0xff]  }
 0x3da   :  { %v5269_v0 = vld [vmem:[%s7044_s8 + $0x438] ss:$28 sps:$4 sm:$0xff]  }
 0x3dc   :  { %3723 = vmatpush1.bf16.msra.mxu0 %v5188_v2  ;;  %3766 = vmatpush1.bf16.msra.mxu1 %v5191_v3  ;;  %v5277_v2 = vld [vmem:[%s7044_s8 + $0x404] ss:$28 sps:$4 sm:$0xff]  }
 0x3dd   :  { %3724 = vmatprep.subr.bf16.mxu0 %v5196_v6  ;;  %3767 = vmatprep.subr.bf16.mxu1 %v5199_v7  ;;  %v5272_v3 = vld [vmem:[%s7044_s8 + $0x80] ss:$28 sps:$4 sm:$0xff]   ;;  %v5280_v7 = vld [vmem:[%s7044_s8 + $0x4c] ss:$28 sps:$4 sm:$0xff]  }
 0x3de   :  { %v5275_v6 = vld [vmem:[%s7044_s8 + $0x400] ss:$28 sps:$4 sm:$0xff]  }
 0x3e0   :  { %3725 = vmatpush2.bf16.msra.mxu0 %v5194_v8  ;;  %3768 = vmatpush2.bf16.msra.mxu1 %v5197_v9  ;;  %v5283_v8 = vld [vmem:[%s7044_s8 + $0x3cc] ss:$28 sps:$4 sm:$0xff]  }
 0x3e1   :  { %3726 = vmatprep.subr.bf16.mxu0 %v5202_v12  ;;  %3769 = vmatprep.subr.bf16.mxu1 %v5205_v13  ;;  %v5278_v9 = vld [vmem:[%s7044_s8 + $0x48] ss:$28 sps:$4 sm:$0xff]   ;;  %v5286_v13 = vld [vmem:[%s7044_s8 + $0x14] ss:$28 sps:$4 sm:$0xff]  }
 0x3e2   :  { %v5281_v12 = vld [vmem:[%s7044_s8 + $0x3c8] ss:$28 sps:$4 sm:$0xff]  }
 0x3e4   :  { %3727 = vmatpush2.bf16.msra.mxu0 %v5200_v15  ;;  %3770 = vmatpush2.bf16.msra.mxu1 %v5203_v16  ;;  %v5289_v15 = vld [vmem:[%s7044_s8 + $0x394] ss:$28 sps:$4 sm:$0xff]  }
 0x3e5   :  { %3728 = vmatprep.subr.bf16.mxu0 %v5208_v17  ;;  %3771 = vmatprep.subr.bf16.mxu1 %v5211_v18  ;;  %v5284_v16 = vld [vmem:[%s7044_s8 + $0x10] ss:$28 sps:$4 sm:$0xff]   ;;  %v5292_v18 = vld [vmem:[%s7044_s8 + $0x35c] ss:$28 sps:$4 sm:$0xff]  }
 0x3e6   :  { %v5287_v17 = vld [vmem:[%s7044_s8 + $0x390] ss:$28 sps:$4 sm:$0xff]  }
 0x3e8   :  { %3729 = vmatpush2.bf16.msra.mxu0 %v5206_v19  ;;  %3772 = vmatpush2.bf16.msra.mxu1 %v5209_v20  ;;  %v5295_v19 = vld [vmem:[%s7044_s8 + $0x6dc] ss:$28 sps:$4 sm:$0xff]  }
 0x3e9   :  { %3730 = vmatprep.subr.bf16.mxu0 %v5214_v21  ;;  %3773 = vmatprep.subr.bf16.mxu1 %v5217_v22  ;;  %v5290_v20 = vld [vmem:[%s7044_s8 + $0x358] ss:$28 sps:$4 sm:$0xff]   ;;  %v5298_v22 = vld [vmem:[%s7044_s8 + $0x324] ss:$28 sps:$4 sm:$0xff]  }
 0x3ea   :  { %v5293_v21 = vld [vmem:[%s7044_s8 + $0x6d8] ss:$28 sps:$4 sm:$0xff]  }
 0x3ec   :  { %3731 = vmatpush2.bf16.msra.mxu0 %v5212_v23  ;;  %3774 = vmatpush2.bf16.msra.mxu1 %v5215_v5  ;;  %v5301_v23 = vld [vmem:[%s7044_s8 + $0x6a4] ss:$28 sps:$4 sm:$0xff]  }
 0x3ed   :  { %3732 = vmatprep.subr.bf16.mxu0 %v5220_v51  ;;  %3775 = vmatprep.subr.bf16.mxu1 %v5223_v24  ;;  %v5296_v5 = vld [vmem:[%s7044_s8 + $0x320] ss:$28 sps:$4 sm:$0xff]   ;;  %v5304_v24 = vld [vmem:[%s7044_s8 + $0x2ec] ss:$28 sps:$4 sm:$0xff]  }
 0x3ee   :  { %v5299_v51 = vld [vmem:[%s7044_s8 + $0x6a0] ss:$28 sps:$4 sm:$0xff]  }
 0x3f0   :  { %3733 = vmatpush2.bf16.msra.mxu0 %v5218_v14  ;;  %3776 = vmatpush2.bf16.msra.mxu1 %v5221_v10  ;;  %v5307_v14 = vld [vmem:[%s7044_s8 + $0x66c] ss:$28 sps:$4 sm:$0xff]  }
 0x3f1   :  { %3734 = vmatprep.subr.bf16.mxu0 %v5226_v25  ;;  %3777 = vmatprep.subr.bf16.mxu1 %v5229_v26  ;;  %v5302_v10 = vld [vmem:[%s7044_s8 + $0x2e8] ss:$28 sps:$4 sm:$0xff]   ;;  %v5310_v26 = vld [vmem:[%s7044_s8 + $0x2b4] ss:$28 sps:$4 sm:$0xff]  }
 0x3f2   :  { %v5305_v25 = vld [vmem:[%s7044_s8 + $0x668] ss:$28 sps:$4 sm:$0xff]  }
 0x3f4   :  { %3735 = vmatpush2.bf16.msra.mxu0 %v5224_v4  ;;  %3778 = vmatpush2.bf16.msra.mxu1 %v5227_v11  ;;  %v5313_v4 = vld [vmem:[%s7044_s8 + $0x634] ss:$28 sps:$4 sm:$0xff]  }
 0x3f5   :  { %3736 = vmatprep.subr.bf16.mxu0 %v5232_v27  ;;  %3779 = vmatprep.subr.bf16.mxu1 %v5235_v30  ;;  %v5308_v11 = vld [vmem:[%s7044_s8 + $0x2b0] ss:$28 sps:$4 sm:$0xff]   ;;  %v5316_v30 = vld [vmem:[%s7044_s8 + $0x27c] ss:$28 sps:$4 sm:$0xff]  }
 0x3f6   :  { %v5311_v27 = vld [vmem:[%s7044_s8 + $0x630] ss:$28 sps:$4 sm:$0xff]  }
 0x3f8   :  { %3737 = vmatpush2.bf16.msra.mxu0 %v5230_v31  ;;  %3780 = vmatpush2.bf16.msra.mxu1 %v5233_v36  ;;  %v5319_v31 = vld [vmem:[%s7044_s8 + $0x5fc] ss:$28 sps:$4 sm:$0xff]  }
 0x3f9   :  { %3738 = vmatprep.subr.bf16.mxu0 %v5238_v37  ;;  %3781 = vmatprep.subr.bf16.mxu1 %v5241_v38  ;;  %v5314_v36 = vld [vmem:[%s7044_s8 + $0x278] ss:$28 sps:$4 sm:$0xff]   ;;  %v5322_v38 = vld [vmem:[%s7044_s8 + $0x244] ss:$28 sps:$4 sm:$0xff]  }
 0x3fa   :  { %v5317_v37 = vld [vmem:[%s7044_s8 + $0x5f8] ss:$28 sps:$4 sm:$0xff]  }
 0x3fc   :  { %3739 = vmatpush2.bf16.msra.mxu0 %v5236_v39  ;;  %3782 = vmatpush2.bf16.msra.mxu1 %v5239_v40  ;;  %v5325_v39 = vld [vmem:[%s7044_s8 + $0x5c4] ss:$28 sps:$4 sm:$0xff]  }
 0x3fd   :  { %3794 = vmatprep.subr.bf16.mxu0 %v5244_v41  ;;  %3837 = vmatprep.subr.bf16.mxu1 %v5247_v42  ;;  %v5320_v40 = vld [vmem:[%s7044_s8 + $0x240] ss:$28 sps:$4 sm:$0xff]   ;;  %v5328_v42 = vld [vmem:[%s7044_s8 + $0x20c] ss:$28 sps:$4 sm:$0xff]  }
 0x3fe   :  { %v5323_v41 = vld [vmem:[%s7044_s8 + $0x5c0] ss:$28 sps:$4 sm:$0xff]  }
 0x3ff   :  { %3741 = vmatmul.mubr.bf16.vlgmr.msra.gmra.mxu0 %v6506_v34  ;;  %3784 = vmatmul.mubr.bf16.vlgmr.msra.gmra.mxu1 %v6508_v35 }
 0x400   :  { %3795 = vmatpush1.bf16.msra.mxu0 %v5242_v43  ;;  %3826 = vmatprep.mubr.bf16.mxu0 %v6496_v28  ;;  %v5331_v43 = vld [vmem:[%s7044_s8 + $0x58c] ss:$28 sps:$4 sm:$0xff]  }
 0x401   :  { %3838 = vmatpush1.bf16.msra.mxu1 %v5245_v44  ;;  %3869 = vmatprep.mubr.bf16.mxu1 %v6498_v29  ;;  %v5326_v44 = vld [vmem:[%s7044_s8 + $0x208] ss:$28 sps:$4 sm:$0xff]  }
 0x402   :  { %3796 = vmatprep.subr.bf16.mxu0 %v5250_v45  ;;  %3839 = vmatprep.subr.bf16.mxu1 %v5253_v46  ;;  %v5329_v45 = vld [vmem:[%s7044_s8 + $0x588] ss:$28 sps:$4 sm:$0xff]   ;;  %v5334_v46 = vld [vmem:[%s7044_s8 + $0x1d4] ss:$28 sps:$4 sm:$0xff]  }
 0x404   :  { %3797 = vmatpush1.bf16.msra.mxu0 %v5248_v47  ;;  %v5337_v47 = vld [vmem:[%s7044_s8 + $0x554] ss:$28 sps:$4 sm:$0xff]  }
 0x405   :  { %3840 = vmatpush1.bf16.msra.mxu1 %v5251_v48  ;;  %3798 = vmatprep.subr.bf16.mxu0 %v5256_v49  ;;  %v5332_v48 = vld [vmem:[%s7044_s8 + $0x1d0] ss:$28 sps:$4 sm:$0xff]  }
 0x406   :  { %3841 = vmatprep.subr.bf16.mxu1 %v5259_v50  ;;  %v5335_v49 = vld [vmem:[%s7044_s8 + $0x550] ss:$28 sps:$4 sm:$0xff]   ;;  %v5338_v50 = vld [vmem:[%s7044_s8 + $0x360] ss:$28 sps:$4 sm:$0xff]  }
 0x408   :  { %3799 = vmatpush1.bf16.msra.mxu0 %v5254_v53  ;;  %v5339_v53 = vld [vmem:[%s7044_s8 + $0x6e0] ss:$28 sps:$4 sm:$0xff]  }
 0x409   :  { %3842 = vmatpush1.bf16.msra.mxu1 %v5257_v54  ;;  %3800 = vmatprep.subr.bf16.mxu0 %v5262_v57  ;;  %v5340_v54 = vld [vmem:[%s7044_s8 + $0x1a0] ss:$28 sps:$4 sm:$0xff]  }
 0x40a   :  { %3843 = vmatprep.subr.bf16.mxu1 %v5265_v59  ;;  %v5341_v57 = vld [vmem:[%s7044_s8 + $0x520] ss:$28 sps:$4 sm:$0xff]   ;;  %v5342_v59 = vld [vmem:[%s7044_s8 + $0x328] ss:$28 sps:$4 sm:$0xff]  }
 0x40c   :  { %3801 = vmatpush1.bf16.msra.mxu0 %v5260_v60  ;;  %v5343_v60 = vld [vmem:[%s7044_s8 + $0x6a8] ss:$28 sps:$4 sm:$0xff]  }
 0x40d   :  { %3844 = vmatpush1.bf16.msra.mxu1 %v5263_v61  ;;  %3802 = vmatprep.subr.bf16.mxu0 %v5268_v62  ;;  %v5344_v61 = vld [vmem:[%s7044_s8 + $0x168] ss:$28 sps:$4 sm:$0xff]  }
 0x40e   :  { %3845 = vmatprep.subr.bf16.mxu1 %v5271_v58  ;;  %v5345_v62 = vld [vmem:[%s7044_s8 + $0x4e8] ss:$28 sps:$4 sm:$0xff]   ;;  %v5346_v58 = vld [vmem:[%s7044_s8 + $0x2f0] ss:$28 sps:$4 sm:$0xff]  }
 0x410   :  { %3803 = vmatpush1.bf16.msra.mxu0 %v5266_v63  ;;  %v5347_v63 = vld [vmem:[%s7044_s8 + $0x670] ss:$28 sps:$4 sm:$0xff]  }
 0x411   :  { %3846 = vmatpush1.bf16.msra.mxu1 %v5269_v0  ;;  %3804 = vmatprep.subr.bf16.mxu0 %v5274_v1  ;;  %v5349_v0 = vld [vmem:[%s7044_s8 + $0x4b0] ss:$28 sps:$4 sm:$0xff]   ;;  %v5351_v1 = vld [vmem:[%s7044_s8 + $0x638] ss:$28 sps:$4 sm:$0xff]  }
 0x412   :  { %3847 = vmatprep.subr.bf16.mxu1 %v5277_v2  ;;  %v5352_v2 = vld [vmem:[%s7044_s8 + $0xf8] ss:$28 sps:$4 sm:$0xff]  }
 0x414   :  { %3805 = vmatpush1.bf16.msra.mxu0 %v5272_v3  ;;  %v5353_v3 = vld [vmem:[%s7044_s8 + $0x478] ss:$28 sps:$4 sm:$0xff]  }
 0x415   :  { %3848 = vmatpush1.bf16.msra.mxu1 %v5275_v6  ;;  %3806 = vmatprep.subr.bf16.mxu0 %v5280_v7  ;;  %v5354_v6 = vld [vmem:[%s7044_s8 + $0x280] ss:$28 sps:$4 sm:$0xff]  }
 0x416   :  { %3849 = vmatprep.subr.bf16.mxu1 %v5283_v8  ;;  %v5355_v7 = vld [vmem:[%s7044_s8 + $0x600] ss:$28 sps:$4 sm:$0xff]  }
 0x417   :  { %v5356_v8 = vld [vmem:[%s7044_s8 + $0xc0] ss:$28 sps:$4 sm:$0xff]  }
 0x418   :  { %3807 = vmatpush1.bf16.msra.mxu0 %v5278_v9  ;;  %v5357_v9 = vld [vmem:[%s7044_s8 + $0x440] ss:$28 sps:$4 sm:$0xff]  }
 0x419   :  { %3850 = vmatpush1.bf16.msra.mxu1 %v5281_v12  ;;  %3808 = vmatprep.subr.bf16.mxu0 %v5286_v13  ;;  %v5358_v12 = vld [vmem:[%s7044_s8 + $0x248] ss:$28 sps:$4 sm:$0xff]  }
 0x41a   :  { %3851 = vmatprep.subr.bf16.mxu1 %v5289_v15  ;;  %v5359_v13 = vld [vmem:[%s7044_s8 + $0x5c8] ss:$28 sps:$4 sm:$0xff]  }
 0x41b   :  { %v5360_v15 = vld [vmem:[%s7044_s8 + $0x88] ss:$28 sps:$4 sm:$0xff]  }
 0x41c   :  { %3809 = vmatpush1.bf16.msra.mxu0 %v5284_v16  ;;  %v5361_v16 = vld [vmem:[%s7044_s8 + $0x408] ss:$28 sps:$4 sm:$0xff]  }
 0x41d   :  { %3852 = vmatpush1.bf16.msra.mxu1 %v5287_v17  ;;  %3810 = vmatprep.subr.bf16.mxu0 %v5292_v18  ;;  %v5362_v17 = vld [vmem:[%s7044_s8 + $0x210] ss:$28 sps:$4 sm:$0xff]  }
 0x41e   :  { %3853 = vmatprep.subr.bf16.mxu1 %v5295_v19  ;;  %v5363_v18 = vld [vmem:[%s7044_s8 + $0x590] ss:$28 sps:$4 sm:$0xff]  }
 0x41f   :  { %v5364_v19 = vld [vmem:[%s7044_s8 + $0x50] ss:$28 sps:$4 sm:$0xff]  }
 0x420   :  { %3811 = vmatpush2.bf16.msra.mxu0 %v5290_v20  ;;  %v5365_v20 = vld [vmem:[%s7044_s8 + $0x3d0] ss:$28 sps:$4 sm:$0xff]  }
 0x421   :  { %3854 = vmatpush2.bf16.msra.mxu1 %v5293_v21  ;;  %3812 = vmatprep.subr.bf16.mxu0 %v5298_v22  ;;  %v5366_v21 = vld [vmem:[%s7044_s8 + $0x1d8] ss:$28 sps:$4 sm:$0xff]  }
 0x422   :  { %3855 = vmatprep.subr.bf16.mxu1 %v5301_v23  ;;  %v5367_v22 = vld [vmem:[%s7044_s8 + $0x558] ss:$28 sps:$4 sm:$0xff]  }
 0x423   :  { %v5368_v23 = vld [vmem:[%s7044_s8 + $0x18] ss:$28 sps:$4 sm:$0xff]  }
 0x424   :  { %3813 = vmatpush2.bf16.msra.mxu0 %v5296_v5  ;;  %v5369_v5 = vld [vmem:[%s7044_s8 + $0x398] ss:$28 sps:$4 sm:$0xff]  }
 0x425   :  { %3856 = vmatpush2.bf16.msra.mxu1 %v5299_v51  ;;  %3814 = vmatprep.subr.bf16.mxu0 %v5304_v24  ;;  %v6997_v51 = vld [vmem:[%s7047_s9] sm:$0x7f] }
 0x426   :  { %3857 = vmatprep.subr.bf16.mxu1 %v5307_v14  ;;  %v2438_v24 = vrot.slane %v6997_v51, %v6235_v56  ;;  %v2442_v14 = vrot.slane %v6997_v51, %v6232_v55 }
 0x428   :  { %3815 = vmatpush2.bf16.msra.mxu0 %v5302_v10 }
 0x429   :  { %3858 = vmatpush2.bf16.msra.mxu1 %v5305_v25  ;;  %3816 = vmatprep.subr.bf16.mxu0 %v5310_v26 }
 0x42a   :  { %3859 = vmatprep.subr.bf16.mxu1 %v5313_v4 }
 0x42c   :  { %3817 = vmatpush2.bf16.msra.mxu0 %v5308_v11 }
 0x42d   :  { %3860 = vmatpush2.bf16.msra.mxu1 %v5311_v27  ;;  %3818 = vmatprep.subr.bf16.mxu0 %v5316_v30 }
 0x42e   :  { %3861 = vmatprep.subr.bf16.mxu1 %v5319_v31 }
 0x430   :  { %3819 = vmatpush2.bf16.msra.mxu0 %v5314_v36 }
 0x431   :  { %3862 = vmatpush2.bf16.msra.mxu1 %v5317_v37  ;;  %3820 = vmatprep.subr.bf16.mxu0 %v5322_v38 }
 0x432   :  { %3863 = vmatprep.subr.bf16.mxu1 %v5325_v39 }
 0x434   :  { %3821 = vmatpush2.bf16.msra.mxu0 %v5320_v40 }
 0x435   :  { %3864 = vmatpush2.bf16.msra.mxu1 %v5323_v41  ;;  %3822 = vmatprep.subr.bf16.mxu0 %v5328_v42 }
 0x436   :  { %3865 = vmatprep.subr.bf16.mxu1 %v5331_v43 }
 0x438   :  { %3823 = vmatpush2.bf16.msra.mxu0 %v5326_v44 }
 0x439   :  { %3866 = vmatpush2.bf16.msra.mxu1 %v5329_v45  ;;  %3824 = vmatprep.subr.bf16.mxu0 %v5334_v46 }
 0x43a   :  { %3867 = vmatprep.subr.bf16.mxu1 %v5337_v47 }
 0x43c   :  { %3825 = vmatpush2.bf16.msra.mxu0 %v5332_v48 }
 0x43d   :  { %3868 = vmatpush2.bf16.msra.mxu1 %v5335_v49  ;;  %4656 = vmatprep.subr.bf16.mxu0 %v5338_v50 }
 0x43e   :  { %4678 = vmatprep.subr.bf16.mxu1 %v5339_v53 }
 0x43f   :  { %3827 = vmatmul.mubr.bf16.vlgmr.msra.gmra.mxu0 %v6506_v34 }
 0x440   :  { %3870 = vmatmul.mubr.bf16.vlgmr.msra.gmra.mxu1 %v6508_v35  ;;  %4657 = vmatpush3.bf16.msra.mxu0 %v5340_v54 }
 0x441   :  { %3912 = vmatprep.mubr.bf16.mxu0 %v6496_v28  ;;  %4679 = vmatpush3.bf16.msra.mxu1 %v5341_v57  ;;  %v5348_v28 = vld [vmem:[%s7044_s8 + $0x130] ss:$28 sps:$4 sm:$0xff]  }
 0x442   :  { %3953 = vmatprep.mubr.bf16.mxu1 %v6498_v29  ;;  %4658 = vmatprep.subr.bf16.mxu0 %v5342_v59  ;;  %v5350_v29 = vld [vmem:[%s7044_s8 + $0x2b8] ss:$28 sps:$4 sm:$0xff]  }
 0x443   :  { %4680 = vmatprep.subr.bf16.mxu1 %v5343_v60 }
 0x444   :  { %4659 = vmatpush3.bf16.msra.mxu0 %v5344_v61 }
 0x445   :  { %4681 = vmatpush3.bf16.msra.mxu1 %v5345_v62  ;;  %4660 = vmatprep.subr.bf16.mxu0 %v5346_v58  ;;  %v2446_v58 = vrot.slane %v6997_v51, %v6247_v33 }
 0x446   :  { %4682 = vmatprep.subr.bf16.mxu1 %v5347_v63  ;;  %v2450_v63 = vrot.slane %v6997_v51, %v6244_v32 }
 0x448   :  { %4661 = vmatpush3.bf16.msra.mxu0 %v5348_v28 }
 0x449   :  { %4683 = vmatpush3.bf16.msra.mxu1 %v5349_v0  ;;  %4662 = vmatprep.subr.bf16.mxu0 %v5350_v29 }
 0x44a   :  { %4684 = vmatprep.subr.bf16.mxu1 %v5351_v1 }
 0x44c   :  { %4663 = vmatpush3.bf16.msra.mxu0 %v5352_v2 }
 0x44d   :  { %4685 = vmatpush3.bf16.msra.mxu1 %v5353_v3  ;;  %4664 = vmatprep.subr.bf16.mxu0 %v5354_v6 }
 0x44e   :  { %4686 = vmatprep.subr.bf16.mxu1 %v5355_v7 }
 0x450   :  { %4665 = vmatpush3.bf16.msra.mxu0 %v5356_v8 }
 0x451   :  { %4687 = vmatpush3.bf16.msra.mxu1 %v5357_v9  ;;  %4666 = vmatprep.subr.bf16.mxu0 %v5358_v12 }
 0x452   :  { %4688 = vmatprep.subr.bf16.mxu1 %v5359_v13 }
 0x454   :  { %4667 = vmatpush3.bf16.msra.mxu0 %v5360_v15 }
 0x455   :  { %4689 = vmatpush3.bf16.msra.mxu1 %v5361_v16  ;;  %4668 = vmatprep.subr.bf16.mxu0 %v5362_v17 }
 0x456   :  { %4690 = vmatprep.subr.bf16.mxu1 %v5363_v18 }
 0x458   :  { %4669 = vmatpush3.bf16.msra.mxu0 %v5364_v19 }
 0x459   :  { %4691 = vmatpush3.bf16.msra.mxu1 %v5365_v20  ;;  %4670 = vmatprep.subr.bf16.mxu0 %v5366_v21 }
 0x45a   :  { %4692 = vmatprep.subr.bf16.mxu1 %v5367_v22 }
 0x45c   :  { %4671 = vmatpush3.bf16.msra.mxu0 %v5368_v23 }
 0x45d   :  { %4693 = vmatpush3.bf16.msra.mxu1 %v5369_v5 }
 0x45f   :  { %3913 = vmatmul.mubr.bf16.vlgmr.msra.gmra.mxu0 %v6506_v34 }
 0x460   :  { %3954 = vmatmul.mubr.bf16.vlgmr.msra.gmra.mxu1 %v6508_v35 }
 0x47f   :  { %v3656_v10 = vpop.f32.mrf.mxu0  ;;  %v3699_v25 = vpop.f32.mrf.mxu1 }
 0x480   :  { %v3657_v26 = vadd.f32 %v3656_v10, %v2438_v24 }
 0x481   :  { %v3658_v4 = vpop.f32.mrf.mxu0  ;;  %v3701_v11 = vpop.f32.mrf.mxu1 }
 0x482   :  { %v3700_v27 = vadd.f32 %v3699_v25, %v3657_v26  ;;  %v3659_v34 = vadd.f32 %v3658_v4, %v2442_v14 }
 0x483   :  { %v3660_v30 = vpop.f32.mrf.mxu0  ;;  %v3703_v35 = vpop.f32.mrf.mxu1 }
 0x484   :  { %v4582_v31 = vmul.f32 -1.442695, %v3700_v27  ;;  %v3702_v36 = vadd.f32 %v3701_v11, %v3659_v34  ;;  %v3661_v37 = vadd.f32 %v3660_v30, %v2438_v24 }
 0x485   :  { %v3662_v38 = vpop.f32.mrf.mxu0  ;;  %v3705_v41 = vpop.f32.mrf.mxu1 }
 0x486   :  { %5374 = vpow2.f32 %v4582_v31  ;;  %v4583_v39 = vmul.f32 -1.442695, %v3702_v36  ;;  %v3704_v40 = vadd.f32 %v3703_v35, %v3661_v37  ;;  %v3663_v56 = vadd.f32 %v3662_v38, %v2442_v14 }
 0x487   :  { %v2453_v35 = vsub.s32 4, %v6229_v52  ;;  %v2457_v31 = vsub.s32 5, %v6229_v52 }
 0x488   :  { %5376 = vpow2.f32 %v4583_v39  ;;  %v4589_v55 = vmul.f32 -1.442695, %v3704_v40  ;;  %v3706_v42 = vadd.f32 %v3705_v41, %v3663_v56 }
 0x489   :  { %v2454_v36 = vrot.slane %v6997_v51, %v2453_v35  ;;  %v2458_v37 = vrot.slane %v6997_v51, %v2457_v31 }
 0x48a   :  { %5378 = vpow2.f32 %v4589_v55  ;;  %v4590_v43 = vmul.f32 -1.442695, %v3706_v42 }
 0x48c   :  { %5380 = vpow2.f32 %v4590_v43 }
 0x493   :  { %v5375_v44 = vpop.eup %5374 }
 0x494   :  { %v4004_v45 = vadd.f32 1.0, %v5375_v44 }
 0x495   :  { %v5377_v46 = vpop.eup %5376 }
 0x496   :  { %v4005_v47 = vadd.f32 1.0, %v5377_v46  ;;  %5382 = vrcp.f32 %v4004_v45 }
 0x497   :  { %v5379_v48 = vpop.eup %5378 }
 0x498   :  { %5384 = vrcp.f32 %v4005_v47  ;;  %v4011_v49 = vadd.f32 1.0, %v5379_v48 }
 0x499   :  { %v5381_v50 = vpop.eup %5380 }
 0x49a   :  { %v4012_v53 = vadd.f32 1.0, %v5381_v50  ;;  %5386 = vrcp.f32 %v4011_v49 }
 0x49c   :  { %5388 = vrcp.f32 %v4012_v53 }
 0x4a3   :  { %v5383_v54 = vpop.eup %5382 }
 0x4a5   :  { %v5385_v57 = vpop.eup %5384 }
 0x4a6   :  { %v4604_v59 = vpack.c.bf16 %v5385_v57, %v5383_v54 }
 0x4a7   :  { %v5387_v60 = vpop.eup %5386 }
 0x4a8   :  { %4090 = vst [vmem:[%s7048_s10] sm:$0xff] %v4604_v59 }
 0x4a9   :  { %v5389_v61 = vpop.eup %5388 }
 0x4aa   :  { %v4608_v62 = vpack.c.bf16 %v5389_v61, %v5387_v60 }
 0x4ac   :  { %4095 = vst [vmem:[%s7048_s10 + $0x1c] sm:$0xff] %v4608_v62 }
 0x4bf   :  { %v3742_v28 = vpop.f32.mrf.mxu0  ;;  %v3785_v0 = vpop.f32.mrf.mxu1 }
 0x4c0   :  { %v3743_v29 = vadd.f32 %v3742_v28, %v2446_v58 }
 0x4c1   :  { %v3744_v1 = vpop.f32.mrf.mxu0  ;;  %v3787_v2 = vpop.f32.mrf.mxu1 }
 0x4c2   :  { %v3786_v3 = vadd.f32 %v3785_v0, %v3743_v29  ;;  %v3745_v6 = vadd.f32 %v3744_v1, %v2450_v63 }
 0x4c3   :  { %v3746_v7 = vpop.f32.mrf.mxu0  ;;  %v3789_v8 = vpop.f32.mrf.mxu1 }
 0x4c4   :  { %v4584_v9 = vmul.f32 -1.442695, %v3786_v3  ;;  %v3788_v12 = vadd.f32 %v3787_v2, %v3745_v6  ;;  %v3747_v13 = vadd.f32 %v3746_v7, %v2446_v58  ;;  %v2461_v2 = vsub.s32 6, %v6229_v52 }
 0x4c5   :  { %v3748_v15 = vpop.f32.mrf.mxu0  ;;  %v3791_v18 = vpop.f32.mrf.mxu1 }
 0x4c6   :  { %5390 = vpow2.f32 %v4584_v9  ;;  %v4585_v16 = vmul.f32 -1.442695, %v3788_v12  ;;  %v3790_v17 = vadd.f32 %v3789_v8, %v3747_v13  ;;  %v3749_v33 = vadd.f32 %v3748_v15, %v2450_v63 }
 0x4c7   :  { %v2462_v7 = vrot.slane %v6997_v51, %v2461_v2 }
 0x4c8   :  { %5392 = vpow2.f32 %v4585_v16  ;;  %v4591_v32 = vmul.f32 -1.442695, %v3790_v17  ;;  %v3792_v19 = vadd.f32 %v3791_v18, %v3749_v33 }
 0x4ca   :  { %5394 = vpow2.f32 %v4591_v32  ;;  %v4592_v20 = vmul.f32 -1.442695, %v3792_v19 }
 0x4cc   :  { %5396 = vpow2.f32 %v4592_v20 }
 0x4d3   :  { %v5391_v21 = vpop.eup %5390 }
 0x4d4   :  { %v4006_v22 = vadd.f32 1.0, %v5391_v21 }
 0x4d5   :  { %v5393_v23 = vpop.eup %5392 }
 0x4d6   :  { %v4007_v5 = vadd.f32 1.0, %v5393_v23  ;;  %5398 = vrcp.f32 %v4006_v22 }
 0x4d7   :  { %v5395_v24 = vpop.eup %5394 }
 0x4d8   :  { %5400 = vrcp.f32 %v4007_v5  ;;  %v4013_v14 = vadd.f32 1.0, %v5395_v24 }
 0x4d9   :  { %v5397_v10 = vpop.eup %5396 }
 0x4da   :  { %v4014_v25 = vadd.f32 1.0, %v5397_v10  ;;  %5402 = vrcp.f32 %v4013_v14 }
 0x4dc   :  { %5404 = vrcp.f32 %v4014_v25 }
 0x4e3   :  { %v5399_v26 = vpop.eup %5398 }
 0x4e5   :  { %v5401_v4 = vpop.eup %5400 }
 0x4e6   :  { %v4605_v11 = vpack.c.bf16 %v5401_v4, %v5399_v26 }
 0x4e7   :  { %v5403_v27 = vpop.eup %5402 }
 0x4e8   :  { %4091 = vst [vmem:[%s7048_s10 + $0x8] sm:$0xff] %v4605_v11 }
 0x4e9   :  { %v5405_v34 = vpop.eup %5404 }
 0x4ea   :  { %v4609_v30 = vpack.c.bf16 %v5405_v34, %v5403_v27 }
 0x4ec   :  { %4096 = vst [vmem:[%s7048_s10 + $0x24] sm:$0xff] %v4609_v30 }
 0x4ff   :  { %v3828_v38 = vpop.f32.mrf.mxu0 }
 0x500   :  { %v3829_v39 = vadd.f32 %v3828_v38, %v2454_v36  ;;  %v3871_v40 = vpop.f32.mrf.mxu1 }
 0x501   :  { %v3830_v56 = vpop.f32.mrf.mxu0 }
 0x502   :  { %v3872_v41 = vadd.f32 %v3871_v40, %v3829_v39  ;;  %v3831_v55 = vadd.f32 %v3830_v56, %v2458_v37  ;;  %v3873_v42 = vpop.f32.mrf.mxu1 }
 0x503   :  { %v3832_v43 = vpop.f32.mrf.mxu0 }
 0x504   :  { %v4586_v44 = vmul.f32 -1.442695, %v3872_v41  ;;  %v3874_v45 = vadd.f32 %v3873_v42, %v3831_v55  ;;  %v3833_v46 = vadd.f32 %v3832_v43, %v2454_v36  ;;  %v3875_v47 = vpop.f32.mrf.mxu1 }
 0x505   :  { %v3834_v48 = vpop.f32.mrf.mxu0 }
 0x506   :  { %5406 = vpow2.f32 %v4586_v44  ;;  %v4587_v49 = vmul.f32 -1.442695, %v3874_v45  ;;  %v3876_v50 = vadd.f32 %v3875_v47, %v3833_v46  ;;  %v3835_v53 = vadd.f32 %v3834_v48, %v2458_v37  ;;  %v3877_v54 = vpop.f32.mrf.mxu1 }
 0x508   :  { %5408 = vpow2.f32 %v4587_v49  ;;  %v4593_v57 = vmul.f32 -1.442695, %v3876_v50  ;;  %v3878_v59 = vadd.f32 %v3877_v54, %v3835_v53 }
 0x50a   :  { %5410 = vpow2.f32 %v4593_v57  ;;  %v4594_v60 = vmul.f32 -1.442695, %v3878_v59 }
 0x50c   :  { %5412 = vpow2.f32 %v4594_v60 }
 0x513   :  { %v5407_v61 = vpop.eup %5406 }
 0x514   :  { %v4008_v62 = vadd.f32 1.0, %v5407_v61 }
 0x515   :  { %v5409_v58 = vpop.eup %5408 }
 0x516   :  { %v4009_v63 = vadd.f32 1.0, %v5409_v58  ;;  %5414 = vrcp.f32 %v4008_v62 }
 0x517   :  { %v5411_v28 = vpop.eup %5410 }
 0x518   :  { %5416 = vrcp.f32 %v4009_v63  ;;  %v4015_v0 = vadd.f32 1.0, %v5411_v28 }
 0x519   :  { %v5413_v29 = vpop.eup %5412 }
 0x51a   :  { %v4016_v1 = vadd.f32 1.0, %v5413_v29  ;;  %5418 = vrcp.f32 %v4015_v0 }
 0x51c   :  { %5420 = vrcp.f32 %v4016_v1 }
 0x51f   :  { %v4672_v3 = vpop.f32.mrf.mxu0 }
 0x520   :  { %v4694_v6 = vpop.f32.mrf.mxu1 }
 0x521   :  { %v4673_v8 = vpop.f32.mrf.mxu0 }
 0x522   :  { %v4674_v9 = vadd.f32 %v4673_v8, %v4672_v3  ;;  %v4695_v12 = vpop.f32.mrf.mxu1 }
 0x523   :  { %v4675_v13 = vpop.f32.mrf.mxu0  ;;  %v5415_v15 = vpop.eup %5414  ;;  %v4696_v17 = vadd.f32 %v4695_v12, %v4694_v6 }
 0x524   :  { %v3915_v16 = vadd.f32 %v4674_v9, %v2462_v7  ;;  %v4697_v33 = vpop.f32.mrf.mxu1 }
 0x525   :  { %v5417_v18 = vpop.eup %5416  ;;  %v4676_v32 = vpop.f32.mrf.mxu0 }
 0x526   :  { %v4606_v19 = vpack.c.bf16 %v5417_v18, %v5415_v15  ;;  %v3956_v20 = vadd.f32 %v4696_v17, %v3915_v16  ;;  %v4677_v21 = vadd.f32 %v4676_v32, %v4675_v13  ;;  %v4698_v22 = vpop.f32.mrf.mxu1 }
 0x527   :  { %v5419_v23 = vpop.eup %5418  ;;  %v4699_v5 = vadd.f32 %v4698_v22, %v4697_v33 }
 0x528   :  { %4092 = vst [vmem:[%s7048_s10 + $0x10] sm:$0xff] %v4606_v19  ;;  %v4588_v52 = vmul.f32 -1.442695, %v3956_v20  ;;  %v3918_v51 = vadd.f32 %v4677_v21, %v2462_v7 }
 0x529   :  { %v5421_v24 = vpop.eup %5420 }
 0x52a   :  { %v4610_v14 = vpack.c.bf16 %v5421_v24, %v5419_v23  ;;  %5422 = vpow2.f32 %v4588_v52  ;;  %v3959_v10 = vadd.f32 %v4699_v5, %v3918_v51 }
 0x52c   :  { %4097 = vst [vmem:[%s7048_s10 + $0x2c] sm:$0xff] %v4610_v14  ;;  %v4595_v25 = vmul.f32 -1.442695, %v3959_v10 }
 0x52e   :  { %5424 = vpow2.f32 %v4595_v25 }
 0x537   :  { %v5423_v26 = vpop.eup %5422 }
 0x538   :  { %v4010_v4 = vadd.f32 1.0, %v5423_v26 }
 0x53a   :  { %5426 = vrcp.f32 %v4010_v4 }
 0x53b   :  { %v5425_v11 = vpop.eup %5424 }
 0x53c   :  { %v4017_v27 = vadd.f32 1.0, %v5425_v11 }
 0x53e   :  { %5428 = vrcp.f32 %v4017_v27 }
 0x547   :  { %v5427_v34 = vpop.eup %5426 }
 0x548   :  { %v4607_v30 = vpack.c.bf16 %v5427_v34, %v5427_v34 }
 0x54a   :  { %4094 = vst.msk [vmem:[%s7048_s10 + $0x18] sm:$0xf] %vm4093_vm3, %v4607_v30 }
 0x54b   :  { %v5429_v35 = vpop.eup %5428 }
 0x54c   :  { %v4611_v31 = vpack.c.bf16 %v5429_v35, %v5429_v35 }
 0x54e   :  { %4098 = vst.msk [vmem:[%s7048_s10 + $0x34] sm:$0xf] %vm4093_vm3, %v4611_v31 }

</bundles_post_ra>
